<compile_context>
chip_gen: v7x
topology: tpu7x:2x2x1
jax: 0.10.0
libtpu: 0.0.40
codegen_flags: <defaults>
</compile_context>

<pallas_src>
import jax
import jax.numpy as jnp
from jax import lax
from jax.experimental import pallas as pl
from jax.experimental.pallas import tpu as pltpu

F32 = jnp.float32
BF16 = jnp.bfloat16


def _softmax_lastdim(x):
    """Softmax along the last axis; denominator reciprocal on the EUP (approx)."""
    m = jnp.max(x, axis=-1, keepdims=True)
    e = jnp.exp(x - m)
    return e * pl.reciprocal(jnp.sum(e, axis=-1, keepdims=True), approx=True)


def make_generator_kernel(Bb, S, H, V, G):
    Nb = Bb * S

    # Row-axis regroup (Nb, K) <-> (Bb, S, K) via static slices + concat along the
    # leading dim (robust across Mosaic reshape support; the lane dim never changes).
    def _split_rows(x2d):
        if Bb == 1:
            return x2d[None, :, :]
        return jnp.concatenate(
            [x2d[None, b * S:(b + 1) * S, :] for b in range(Bb)], axis=0)

    def _merge_rows(x3d):
        if Bb == 1:
            return x3d[0]
        return jnp.concatenate([x3d[b] for b in range(Bb)], axis=0)

    def kernel(h0_ref, decin0_ref, utt_ref, uttm_ref, st_ref, stm_ref,
               ohd_ref, ohs_ref, emb_ref,
               wihr_ref, wihz_ref, wihn_ref, whhr_ref, whhz_ref, whhn_ref,
               br_ref, bz_ref, bin_ref, bhn_ref,
               wr0_ref, wr1g_ref, wr2_ref, wr3_ref, brat_ref, bgate_ref,
               point_out_ref, gate_out_ref,
               hidden_scr, decin_scr):
        w = pl.program_id(1)        # decode step (grid axis 0 is the batch block)

        # ---- per-(batch-block) init: hidden = encoded_hidden, input = slot emb ----
        @pl.when(w == 0)
        def _init():
            hidden_scr[...] = h0_ref[...]
            decin_scr[...] = decin0_ref[...]

        x = decin_scr[...]                           # decoder_input (Nb, H) f32
        h = hidden_scr[...]                          # hidden        (Nb, H) f32
        xb = x.astype(BF16)
        hb = h.astype(BF16)

        # ---- GRU cell (single layer, seq_len=1); per-gate lane-aligned bf16 dots ----
        r = jax.nn.sigmoid(
            jnp.dot(xb, wihr_ref[...], preferred_element_type=F32)
            + jnp.dot(hb, whhr_ref[...], preferred_element_type=F32) + br_ref[...])
        z = jax.nn.sigmoid(
            jnp.dot(xb, wihz_ref[...], preferred_element_type=F32)
            + jnp.dot(hb, whhz_ref[...], preferred_element_type=F32) + bz_ref[...])
        hn = jnp.dot(hb, whhn_ref[...], preferred_element_type=F32) + bhn_ref[...]
        n = jnp.tanh(jnp.dot(xb, wihn_ref[...], preferred_element_type=F32)
                     + bin_ref[...] + r * hn)
        h_new = (1.0 - z) * n + z * h                # == dec_state == new hidden
        hb_new = h_new.astype(BF16)

        # ---- attend(seq, cond, lens): batched MXU contractions over the TRUE batch ----
        h3 = _split_rows(hb_new)                     # (Bb, S, H) bf16

        def attend(seq_bf, addmask):
            scores = lax.dot_general(h3, seq_bf, (((2,), (2,)), ((0,), (0,))),
                                     preferred_element_type=F32)        # (Bb, S, L)
            scores = scores + addmask[:, None, :]
            prob_bf = _softmax_lastdim(scores).astype(BF16)              # (Bb, S, L)
            ctx = lax.dot_general(prob_bf, seq_bf, (((2,), (1,)), ((0,), (0,))),
                                  preferred_element_type=F32)            # (Bb, S, H)
            return _merge_rows(ctx), prob_bf

        context_vec, context_prob_bf = attend(utt_ref[...], uttm_ref[...])
        state_vec, state_prob_bf = attend(st_ref[...], stm_ref[...])
        ctx_bf = context_vec.astype(BF16)
        stv_bf = state_vec.astype(BF16)

        # ---- fused context projection: [W_ratio(ctx cols) | W_gate] in one MXU pass ----
        ctx_proj = jnp.dot(ctx_bf, wr1g_ref[...], preferred_element_type=F32)  # (Nb,3+G)

        @pl.when(w == 0)
        def _gate():
            gate_out_ref[...] = ctx_proj[:, 3:3 + G] + bgate_ref[...]

        # ---- pointer switches: softmax(W_ratio([h; ctx; st; x])) via pre-split slices ----
        switch_logits = (jnp.dot(hb_new, wr0_ref[...], preferred_element_type=F32)
                         + ctx_proj[:, 0:3]
                         + jnp.dot(stv_bf, wr2_ref[...], preferred_element_type=F32)
                         + jnp.dot(xb, wr3_ref[...], preferred_element_type=F32)
                         + brat_ref[...])
        switch = _softmax_lastdim(switch_logits)                                # (Nb, 3)

        # ---- vocabulary distribution: softmax(h_new @ emb^T), single emb copy ----
        logits = lax.dot_general(hb_new, emb_ref[...], (((1,), (1,)), ((), ())),
                                 preferred_element_type=F32)                    # (Nb, V)
        p_vocab = _softmax_lastdim(logits)

        # ---- final mixture accumulated into a single (Nb, V) buffer ----
        # switch[:, 2:3] is the exact mathematical equivalent of (1 - vocab - state).
        final_p = switch[:, 0:1] * p_vocab
        p_state_ptr = _merge_rows(
            lax.dot_general(state_prob_bf, ohs_ref[...], (((2,), (1,)), ((0,), (0,))),
                            preferred_element_type=F32))                        # (Nb, V)
        final_p = final_p + switch[:, 1:2] * p_state_ptr
        p_context_ptr = _merge_rows(
            lax.dot_general(context_prob_bf, ohd_ref[...], (((2,), (1,)), ((0,), (0,))),
                            preferred_element_type=F32))                        # (Nb, V)
        final_p = final_p + switch[:, 2:3] * p_context_ptr

        point_out_ref[...] = final_p[None, :, :]                                # (1, Nb, V)

        # ---- greedy next token (first-occurrence argmax) -> embedding lookup ----
        # TODO(synk): replace the bf16 one-hot MXU lookup with an SMEM-index / DMA
        #             gather from emb to drop the O(Nb*V*H) MACs per decode step.
        iota_v = lax.broadcasted_iota(jnp.int32, (Nb, V), 1)
        mx = jnp.max(final_p, axis=1, keepdims=True)
        pred = jnp.min(jnp.where(final_p == mx, iota_v, V), axis=1, keepdims=True)
        oh_pred = (iota_v == pred).astype(BF16)
        decin_scr[...] = jnp.dot(oh_pred, emb_ref[...], preferred_element_type=F32)
        hidden_scr[...] = h_new

    return kernel


def _pick_vmem_limit():
    # Leave headroom for compiler scratch / pipeline buffers (v7x has only 64 MiB of
    # physical VMEM per TensorCore; v5e/v6e have 128 MiB).
    try:
        phys = pltpu.get_tpu_info().vmem_capacity_bytes
    except Exception:
        phys = 64 * 1024 * 1024
    return int(min(64 * 1024 * 1024, (phys * 3) // 4))


def _block_spec(shape, index_map, single_buffer=False):
    # All inputs are invariant along the inner decode axis: request single buffering
    # (halves resident input VMEM) when the API supports it, else fall back.
    if single_buffer and hasattr(pl, "Buffered"):
        try:
            return pl.BlockSpec(shape, index_map, pipeline_mode=pl.Buffered(1))
        except TypeError:
            pass
    return pl.BlockSpec(shape, index_map)


def generator_forward(params, encoded_hidden, utt_out, utt_lens, st_out, st_lens,
                      dlg, last_state, max_res_len, slot_emb_arr,
                      num_batch_blocks=1):
    """Greedy (use_teacher_forcing=False) decode of `Generator.forward`.

    Row layout: n = b * S + s (batch-major slot fold).  `num_batch_blocks` splits the
    batch across grid axis 0 ("parallel") so v7x megacore can use both TensorCores;
    when > 1, (B / num_batch_blocks) * S must be a multiple of 8 (sublane tiling).
    """
    B, LU, H = utt_out.shape
    LS = st_out.shape[1]
    V = params["emb"].shape[0]
    G = params["w_gate"].shape[1]
    S = slot_emb_arr.shape[0]
    R = int(max_res_len)
    N = B * S

    assert B % num_batch_blocks == 0
    Bb = B // num_batch_blocks
    Nb = Bb * S
    if num_batch_blocks > 1:
        assert Nb % 8 == 0, "per-block row count must be sublane aligned"

    def make_mask(lens, L):
        pos = jnp.arange(L, dtype=jnp.int32)[None, :]
        # clamp to >= 1 so a zero-length row never yields an all -inf softmax (NaN)
        l = jnp.maximum(jnp.asarray(lens, dtype=jnp.int32), 1)[:, None]
        return jnp.where(pos < l, 0.0, -jnp.inf).astype(F32)

    utt_mask = make_mask(utt_lens, LU)                                   # (B, LU)
    st_mask = make_mask(st_lens, LS)                                     # (B, LS)

    # scatter_add one-hots, built once, bf16 (exact for 0/1), kept at batch B
    vid = jnp.arange(V, dtype=jnp.int32)[None, None, :]
    oh_dlg = (dlg.astype(jnp.int32)[:, :, None] == vid).astype(BF16)     # (B, LU, V)
    oh_st = (last_state.astype(jnp.int32)[:, :, None] == vid).astype(BF16)

    # batch-major slot fold of the per-row carries: row n = b * S + s
    h0 = jnp.repeat(encoded_hidden.astype(F32), S, axis=0)               # (N, H)
    decin0 = jnp.tile(slot_emb_arr.astype(F32), (B, 1))                  # (N, H)

    # encoder outputs stay at batch B, carried in bf16 for the MXU contractions
    utt_bf = utt_out.astype(BF16)                                        # (B, LU, H)
    st_bf = st_out.astype(BF16)                                          # (B, LS, H)
    emb_bf = params["emb"].astype(BF16)                                  # (V, H)

    # GRU weights pre-split per gate (lane-aligned dots); biases pre-combined
    wih, whh = params["w_ih"], params["w_hh"]
    wih_r, wih_z, wih_n = (wih[:, 0:H].astype(BF16), wih[:, H:2 * H].astype(BF16),
                           wih[:, 2 * H:3 * H].astype(BF16))
    whh_r, whh_z, whh_n = (whh[:, 0:H].astype(BF16), whh[:, H:2 * H].astype(BF16),
                           whh[:, 2 * H:3 * H].astype(BF16))
    bih = params["b_ih"].astype(F32).reshape(1, 3 * H)
    bhh = params["b_hh"].astype(F32).reshape(1, 3 * H)
    b_r = bih[:, 0:H] + bhh[:, 0:H]
    b_z = bih[:, H:2 * H] + bhh[:, H:2 * H]
    b_in = bih[:, 2 * H:3 * H]
    b_hn = bhh[:, 2 * H:3 * H]

    # W_ratio pre-split by input slice; context slice fused with W_gate
    wr = params["w_ratio"]
    wr0 = wr[0:H].astype(BF16)                                           # (H, 3) h_new
    wr1g = jnp.concatenate([wr[H:2 * H], params["w_gate"]], axis=1).astype(BF16)  # (H, 3+G)
    wr2 = wr[2 * H:3 * H].astype(BF16)                                   # (H, 3) state
    wr3 = wr[3 * H:4 * H].astype(BF16)                                   # (H, 3) x
    brat = params["b_ratio"].astype(F32).reshape(1, 3)
    bgate = params["b_gate"].astype(F32).reshape(1, G)

    inputs = (h0, decin0, utt_bf, utt_mask, st_bf, st_mask, oh_dlg, oh_st,
              emb_bf, wih_r, wih_z, wih_n, whh_r, whh_z, whh_n,
              b_r, b_z, b_in, b_hn,
              wr0, wr1g, wr2, wr3, brat, bgate)

    def batched_spec(full_shape, blk0):
        nd = len(full_shape)
        blk = (blk0,) + tuple(full_shape[1:])
        return _block_spec(blk, lambda bb, w, nd=nd: (bb,) + (0,) * (nd - 1),
                           single_buffer=True)

    def invariant_spec(full_shape):
        nd = len(full_shape)
        return _block_spec(tuple(full_shape), lambda bb, w, nd=nd: (0,) * nd,
                           single_buffer=True)

    in_specs = [
        batched_spec(h0.shape, Nb),
        batched_spec(decin0.shape, Nb),
        batched_spec(utt_bf.shape, Bb),
        batched_spec(utt_mask.shape, Bb),
        batched_spec(st_bf.shape, Bb),
        batched_spec(st_mask.shape, Bb),
        batched_spec(oh_dlg.shape, Bb),
        batched_spec(oh_st.shape, Bb),
    ] + [invariant_spec(a.shape) for a in inputs[8:]]

    out_shapes = (
        jax.ShapeDtypeStruct((R, N, V), F32),    # per-step lane-dense (·, ·, V) slabs
        jax.ShapeDtypeStruct((N, G), F32),
    )
    out_specs = (
        pl.BlockSpec((1, Nb, V), lambda bb, w: (w, bb, 0)),
        pl.BlockSpec((Nb, G), lambda bb, w: (bb, 0)),
    )

    kernel = make_generator_kernel(Bb, S, H, V, G)

    point_out, gate_out = pl.pallas_call(
        kernel,
        out_shape=out_shapes,
        grid_spec=pltpu.PrefetchScalarGridSpec(
            num_scalar_prefetch=0,
            grid=(num_batch_blocks, R),
            in_specs=in_specs,
            out_specs=out_specs,
            scratch_shapes=[pltpu.VMEM((Nb, H), F32),    # hidden carry
                            pltpu.VMEM((Nb, H), F32)],   # decoder_input carry
        ),
        compiler_params=pltpu.CompilerParams(
            dimension_semantics=("parallel", "arbitrary"),
            vmem_limit_bytes=_pick_vmem_limit()),
    )(*inputs)

    # PyTorch layouts: (num_slots, batch, max_res_len, vocab), (num_slots, batch, nb_gate)
    all_point_outputs = jnp.transpose(point_out.reshape(R, B, S, V), (2, 1, 0, 3))
    all_gate_outputs = jnp.transpose(gate_out.reshape(B, S, G), (1, 0, 2))
    return all_point_outputs, all_gate_outputs


if __name__ == "__main__":
    # Small, forward-consistent shapes
    B, H, V = 2, 32, 64
    LU, LS = 8, 6
    NB_GATE = 3
    MAX_RES_LEN = 4
    slots = ["hotel-pricerange", "hotel-area", "train-day"]
    slot_temp = slots

    key = jax.random.PRNGKey(0)
    ks = jax.random.split(key, 16)

    # --- deterministic "module" parameters ---
    emb = 0.1 * jax.random.normal(ks[0], (V, H), jnp.float32)                # shared embedding
    w_ih = 0.1 * jax.random.normal(ks[1], (H, 3 * H), jnp.float32)           # GRU (transposed)
    w_hh = 0.1 * jax.random.normal(ks[2], (H, 3 * H), jnp.float32)
    b_ih = 0.1 * jax.random.normal(ks[3], (1, 3 * H), jnp.float32)
    b_hh = 0.1 * jax.random.normal(ks[4], (1, 3 * H), jnp.float32)
    w_ratio = 0.1 * jax.random.normal(ks[5], (4 * H, 3), jnp.float32)        # W_ratio (transposed)
    b_ratio = 0.1 * jax.random.normal(ks[6], (1, 3), jnp.float32)
    w_gate = 0.1 * jax.random.normal(ks[7], (H, NB_GATE), jnp.float32)       # W_gate (transposed)
    b_gate = 0.1 * jax.random.normal(ks[8], (1, NB_GATE), jnp.float32)

    # slot_w2i / Slot_emb, identical logic to the PyTorch __init__
    slot_w2i = {}
    for slot in slots:
        d, nm = slot.split("-")[0], slot.split("-")[1]
        if d not in slot_w2i:
            slot_w2i[d] = len(slot_w2i)
        if nm not in slot_w2i:
            slot_w2i[nm] = len(slot_w2i)
    slot_emb_table = 0.1 * jax.random.normal(ks[9], (len(slot_w2i), H), jnp.float32)
    slot_emb_arr = jnp.stack(
        [slot_emb_table[slot_w2i[s.split("-")[0]]] + slot_emb_table[slot_w2i[s.split("-")[1]]]
         for s in slot_temp], axis=0)                                        # (S, H)

    params = dict(emb=emb, w_ih=w_ih, w_hh=w_hh, b_ih=b_ih, b_hh=b_hh,
                  w_ratio=w_ratio, b_ratio=b_ratio, w_gate=w_gate, b_gate=b_gate)

    # --- deterministic example inputs ---
    encoded_hidden = jax.random.normal(ks[10], (B, H), jnp.float32)          # (1,B,H) squeezed
    utt_out = jax.random.normal(ks[11], (B, LU, H), jnp.float32)
    st_out = jax.random.normal(ks[12], (B, LS, H), jnp.float32)
    utt_lens = [LU, 5]
    st_lens = [LS, 3]
    dlg = jax.random.randint(ks[13], (B, LU), 0, V, jnp.int32)
    last_state = jax.random.randint(ks[14], (B, LS), 0, V, jnp.int32)

    all_point_outputs, all_gate_outputs = generator_forward(
        params, encoded_hidden, utt_out, utt_lens, st_out, st_lens,
        dlg, last_state, MAX_RES_LEN, slot_emb_arr)

    jax.block_until_ready((all_point_outputs, all_gate_outputs))
    assert all_point_outputs.shape == (len(slot_temp), B, MAX_RES_LEN, V)
    assert all_gate_outputs.shape == (len(slot_temp), B, NB_GATE)
    assert bool(jnp.all(jnp.isfinite(all_point_outputs)))
    assert bool(jnp.all(jnp.isfinite(all_gate_outputs)))
    # each output row is a convex mixture of three softmax distributions -> sums to ~1
    row_sums = jnp.sum(all_point_outputs, axis=-1)
    assert bool(jnp.all(jnp.abs(row_sums - 1.0) < 0.05))
    print("KERNEL_OK")
</pallas_src>

<mosaic_0001>
module attributes {stable_mosaic.version = 11 : i64} {
  func.func @kernel(%arg0: i32, %arg1: i32, %arg2: memref<6x32xf32, #tpu.memory_space<vmem>>, %arg3: memref<6x32xf32, #tpu.memory_space<vmem>>, %arg4: memref<2x8x32xbf16, #tpu.memory_space<vmem>>, %arg5: memref<2x8xf32, #tpu.memory_space<vmem>>, %arg6: memref<2x6x32xbf16, #tpu.memory_space<vmem>>, %arg7: memref<2x6xf32, #tpu.memory_space<vmem>>, %arg8: memref<2x8x64xbf16, #tpu.memory_space<vmem>>, %arg9: memref<2x6x64xbf16, #tpu.memory_space<vmem>>, %arg10: memref<64x32xbf16, #tpu.memory_space<vmem>>, %arg11: memref<32x32xbf16, #tpu.memory_space<vmem>>, %arg12: memref<32x32xbf16, #tpu.memory_space<vmem>>, %arg13: memref<32x32xbf16, #tpu.memory_space<vmem>>, %arg14: memref<32x32xbf16, #tpu.memory_space<vmem>>, %arg15: memref<32x32xbf16, #tpu.memory_space<vmem>>, %arg16: memref<32x32xbf16, #tpu.memory_space<vmem>>, %arg17: memref<1x32xf32, #tpu.memory_space<vmem>>, %arg18: memref<1x32xf32, #tpu.memory_space<vmem>>, %arg19: memref<1x32xf32, #tpu.memory_space<vmem>>, %arg20: memref<1x32xf32, #tpu.memory_space<vmem>>, %arg21: memref<32x3xbf16, #tpu.memory_space<vmem>>, %arg22: memref<32x6xbf16, #tpu.memory_space<vmem>>, %arg23: memref<32x3xbf16, #tpu.memory_space<vmem>>, %arg24: memref<32x3xbf16, #tpu.memory_space<vmem>>, %arg25: memref<1x3xf32, #tpu.memory_space<vmem>>, %arg26: memref<1x3xf32, #tpu.memory_space<vmem>>, %arg27: memref<1x6x64xf32, #tpu.memory_space<vmem>>, %arg28: memref<6x3xf32, #tpu.memory_space<vmem>>, %arg29: memref<6x32xf32, #tpu.memory_space<vmem>>, %arg30: memref<6x32xf32, #tpu.memory_space<vmem>>) attributes {dimension_semantics = [#tpu.dimension_semantics<parallel>, #tpu.dimension_semantics<arbitrary>], iteration_bounds = array<i64: 1, 4>, scalar_prefetch = 0 : i64, scratch_operands = 2 : i64, tpu.core_type = #tpu.core_type<tc>, window_params = [{pipeline_mode = #tpu.pipeline_mode<synchronous>, transform_indices = @transform_0, window_bounds = array<i64: 6, 32>}, {pipeline_mode = #tpu.pipeline_mode<synchronous>, transform_indices = @transform_1, window_bounds = array<i64: 6, 32>}, {pipeline_mode = #tpu.pipeline_mode<synchronous>, transform_indices = @transform_2, window_bounds = array<i64: 2, 8, 32>}, {pipeline_mode = #tpu.pipeline_mode<synchronous>, transform_indices = @transform_3, window_bounds = array<i64: 2, 8>}, {pipeline_mode = #tpu.pipeline_mode<synchronous>, transform_indices = @transform_4, window_bounds = array<i64: 2, 6, 32>}, {pipeline_mode = #tpu.pipeline_mode<synchronous>, transform_indices = @transform_5, window_bounds = array<i64: 2, 6>}, {pipeline_mode = #tpu.pipeline_mode<synchronous>, transform_indices = @transform_6, window_bounds = array<i64: 2, 8, 64>}, {pipeline_mode = #tpu.pipeline_mode<synchronous>, transform_indices = @transform_7, window_bounds = array<i64: 2, 6, 64>}, {pipeline_mode = #tpu.pipeline_mode<synchronous>, transform_indices = @transform_8, window_bounds = array<i64: 64, 32>}, {pipeline_mode = #tpu.pipeline_mode<synchronous>, transform_indices = @transform_9, window_bounds = array<i64: 32, 32>}, {pipeline_mode = #tpu.pipeline_mode<synchronous>, transform_indices = @transform_10, window_bounds = array<i64: 32, 32>}, {pipeline_mode = #tpu.pipeline_mode<synchronous>, transform_indices = @transform_11, window_bounds = array<i64: 32, 32>}, {pipeline_mode = #tpu.pipeline_mode<synchronous>, transform_indices = @transform_12, window_bounds = array<i64: 32, 32>}, {pipeline_mode = #tpu.pipeline_mode<synchronous>, transform_indices = @transform_13, window_bounds = array<i64: 32, 32>}, {pipeline_mode = #tpu.pipeline_mode<synchronous>, transform_indices = @transform_14, window_bounds = array<i64: 32, 32>}, {pipeline_mode = #tpu.pipeline_mode<synchronous>, transform_indices = @transform_15, window_bounds = array<i64: 1, 32>}, {pipeline_mode = #tpu.pipeline_mode<synchronous>, transform_indices = @transform_16, window_bounds = array<i64: 1, 32>}, {pipeline_mode = #tpu.pipeline_mode<synchronous>, transform_indices = @transform_17, window_bounds = array<i64: 1, 32>}, {pipeline_mode = #tpu.pipeline_mode<synchronous>, transform_indices = @transform_18, window_bounds = array<i64: 1, 32>}, {pipeline_mode = #tpu.pipeline_mode<synchronous>, transform_indices = @transform_19, window_bounds = array<i64: 32, 3>}, {pipeline_mode = #tpu.pipeline_mode<synchronous>, transform_indices = @transform_20, window_bounds = array<i64: 32, 6>}, {pipeline_mode = #tpu.pipeline_mode<synchronous>, transform_indices = @transform_21, window_bounds = array<i64: 32, 3>}, {pipeline_mode = #tpu.pipeline_mode<synchronous>, transform_indices = @transform_22, window_bounds = array<i64: 32, 3>}, {pipeline_mode = #tpu.pipeline_mode<synchronous>, transform_indices = @transform_23, window_bounds = array<i64: 1, 3>}, {pipeline_mode = #tpu.pipeline_mode<synchronous>, transform_indices = @transform_24, window_bounds = array<i64: 1, 3>}, {transform_indices = @transform_25, window_bounds = array<i64: 1, 6, 64>}, {transform_indices = @transform_26, window_bounds = array<i64: 6, 3>}]} {
    %c0_i32 = arith.constant 0 : i32
    %0 = arith.cmpi eq, %arg1, %c0_i32 : i32
    %1 = arith.extui %0 : i1 to i32
    %c0_i32_0 = arith.constant 0 : i32
    %2 = arith.cmpi ne, %1, %c0_i32_0 : i32
    scf.if %2 {
      %c0_93 = arith.constant 0 : index
      %c0_94 = arith.constant 0 : index
      %190 = vector.load %arg2[%c0_93, %c0_94] : memref<6x32xf32, #tpu.memory_space<vmem>>, vector<6x32xf32>
      %c0_95 = arith.constant 0 : index
      %c0_96 = arith.constant 0 : index
      %191 = vector.load %arg29[%c0_95, %c0_96] : memref<6x32xf32, #tpu.memory_space<vmem>>, vector<6x32xf32>
      tpu.vector_store %arg29[%c0_95, %c0_96], %190 {strides = array<i32>} : memref<6x32xf32, #tpu.memory_space<vmem>>, vector<6x32xf32>,
      %c0_97 = arith.constant 0 : index
      %c0_98 = arith.constant 0 : index
      %192 = vector.load %arg3[%c0_97, %c0_98] : memref<6x32xf32, #tpu.memory_space<vmem>>, vector<6x32xf32>
      %c0_99 = arith.constant 0 : index
      %c0_100 = arith.constant 0 : index
      %193 = vector.load %arg30[%c0_99, %c0_100] : memref<6x32xf32, #tpu.memory_space<vmem>>, vector<6x32xf32>
      tpu.vector_store %arg30[%c0_99, %c0_100], %192 {strides = array<i32>} : memref<6x32xf32, #tpu.memory_space<vmem>>, vector<6x32xf32>,
    } else {
    }
    %c0 = arith.constant 0 : index
    %c0_1 = arith.constant 0 : index
    %3 = vector.load %arg30[%c0, %c0_1] : memref<6x32xf32, #tpu.memory_space<vmem>>, vector<6x32xf32>
    %c0_2 = arith.constant 0 : index
    %c0_3 = arith.constant 0 : index
    %4 = vector.load %arg29[%c0_2, %c0_3] : memref<6x32xf32, #tpu.memory_space<vmem>>, vector<6x32xf32>
    %5 = arith.truncf %3 : vector<6x32xf32> to vector<6x32xbf16>
    %6 = arith.truncf %4 : vector<6x32xf32> to vector<6x32xbf16>
    %c0_4 = arith.constant 0 : index
    %c0_5 = arith.constant 0 : index
    %7 = vector.load %arg11[%c0_4, %c0_5] : memref<32x32xbf16, #tpu.memory_space<vmem>>, vector<32x32xbf16>
    %cst = arith.constant dense<0.000000e+00> : vector<6x32xf32>
    %8 = tpu.matmul %5, %7, %cst {dimension_numbers = #tpu.dot_dimension_numbers<[1], [0], [0], [1], [0, 0, 1, 1], [], []>} : vector<6x32xbf16>, vector<32x32xbf16>, vector<6x32xf32> -> vector<6x32xf32>
    %c0_6 = arith.constant 0 : index
    %c0_7 = arith.constant 0 : index
    %9 = vector.load %arg14[%c0_6, %c0_7] : memref<32x32xbf16, #tpu.memory_space<vmem>>, vector<32x32xbf16>
    %cst_8 = arith.constant dense<0.000000e+00> : vector<6x32xf32>
    %10 = tpu.matmul %6, %9, %cst_8 {dimension_numbers = #tpu.dot_dimension_numbers<[1], [0], [0], [1], [0, 0, 1, 1], [], []>} : vector<6x32xbf16>, vector<32x32xbf16>, vector<6x32xf32> -> vector<6x32xf32>
    %11 = arith.addf %8, %10 : vector<6x32xf32>
    %c0_9 = arith.constant 0 : index
    %c0_10 = arith.constant 0 : index
    %12 = vector.load %arg17[%c0_9, %c0_10] : memref<1x32xf32, #tpu.memory_space<vmem>>, vector<1x32xf32>
    %13 = vector.broadcast %12 : vector<1x32xf32> to vector<6x32xf32>
    %14 = arith.addf %11, %13 : vector<6x32xf32>
    %15 = arith.negf %14 : vector<6x32xf32>
    %16 = math.exp %15 : vector<6x32xf32>
    %cst_11 = arith.constant 1.000000e+00 : f32
    %17 = vector.broadcast %cst_11 : f32 to vector<6x32xf32>
    %18 = arith.addf %17, %16 : vector<6x32xf32>
    %19 = arith.divf %17, %18 : vector<6x32xf32>
    %c0_12 = arith.constant 0 : index
    %c0_13 = arith.constant 0 : index
    %20 = vector.load %arg12[%c0_12, %c0_13] : memref<32x32xbf16, #tpu.memory_space<vmem>>, vector<32x32xbf16>
    %cst_14 = arith.constant dense<0.000000e+00> : vector<6x32xf32>
    %21 = tpu.matmul %5, %20, %cst_14 {dimension_numbers = #tpu.dot_dimension_numbers<[1], [0], [0], [1], [0, 0, 1, 1], [], []>} : vector<6x32xbf16>, vector<32x32xbf16>, vector<6x32xf32> -> vector<6x32xf32>
    %c0_15 = arith.constant 0 : index
    %c0_16 = arith.constant 0 : index
    %22 = vector.load %arg15[%c0_15, %c0_16] : memref<32x32xbf16, #tpu.memory_space<vmem>>, vector<32x32xbf16>
    %cst_17 = arith.constant dense<0.000000e+00> : vector<6x32xf32>
    %23 = tpu.matmul %6, %22, %cst_17 {dimension_numbers = #tpu.dot_dimension_numbers<[1], [0], [0], [1], [0, 0, 1, 1], [], []>} : vector<6x32xbf16>, vector<32x32xbf16>, vector<6x32xf32> -> vector<6x32xf32>
    %24 = arith.addf %21, %23 : vector<6x32xf32>
    %c0_18 = arith.constant 0 : index
    %c0_19 = arith.constant 0 : index
    %25 = vector.load %arg18[%c0_18, %c0_19] : memref<1x32xf32, #tpu.memory_space<vmem>>, vector<1x32xf32>
    %26 = vector.broadcast %25 : vector<1x32xf32> to vector<6x32xf32>
    %27 = arith.addf %24, %26 : vector<6x32xf32>
    %28 = arith.negf %27 : vector<6x32xf32>
    %29 = math.exp %28 : vector<6x32xf32>
    %cst_20 = arith.constant 1.000000e+00 : f32
    %30 = vector.broadcast %cst_20 : f32 to vector<6x32xf32>
    %31 = arith.addf %30, %29 : vector<6x32xf32>
    %32 = arith.divf %30, %31 : vector<6x32xf32>
    %c0_21 = arith.constant 0 : index
    %c0_22 = arith.constant 0 : index
    %33 = vector.load %arg16[%c0_21, %c0_22] : memref<32x32xbf16, #tpu.memory_space<vmem>>, vector<32x32xbf16>
    %cst_23 = arith.constant dense<0.000000e+00> : vector<6x32xf32>
    %34 = tpu.matmul %6, %33, %cst_23 {dimension_numbers = #tpu.dot_dimension_numbers<[1], [0], [0], [1], [0, 0, 1, 1], [], []>} : vector<6x32xbf16>, vector<32x32xbf16>, vector<6x32xf32> -> vector<6x32xf32>
    %c0_24 = arith.constant 0 : index
    %c0_25 = arith.constant 0 : index
    %35 = vector.load %arg20[%c0_24, %c0_25] : memref<1x32xf32, #tpu.memory_space<vmem>>, vector<1x32xf32>
    %36 = vector.broadcast %35 : vector<1x32xf32> to vector<6x32xf32>
    %37 = arith.addf %34, %36 : vector<6x32xf32>
    %c0_26 = arith.constant 0 : index
    %c0_27 = arith.constant 0 : index
    %38 = vector.load %arg13[%c0_26, %c0_27] : memref<32x32xbf16, #tpu.memory_space<vmem>>, vector<32x32xbf16>
    %cst_28 = arith.constant dense<0.000000e+00> : vector<6x32xf32>
    %39 = tpu.matmul %5, %38, %cst_28 {dimension_numbers = #tpu.dot_dimension_numbers<[1], [0], [0], [1], [0, 0, 1, 1], [], []>} : vector<6x32xbf16>, vector<32x32xbf16>, vector<6x32xf32> -> vector<6x32xf32>
    %c0_29 = arith.constant 0 : index
    %c0_30 = arith.constant 0 : index
    %40 = vector.load %arg19[%c0_29, %c0_30] : memref<1x32xf32, #tpu.memory_space<vmem>>, vector<1x32xf32>
    %41 = vector.broadcast %40 : vector<1x32xf32> to vector<6x32xf32>
    %42 = arith.addf %39, %41 : vector<6x32xf32>
    %43 = arith.mulf %19, %37 : vector<6x32xf32>
    %44 = arith.addf %42, %43 : vector<6x32xf32>
    %45 = math.tanh %44 : vector<6x32xf32>
    %cst_31 = arith.constant 1.000000e+00 : f32
    %46 = vector.broadcast %cst_31 : f32 to vector<6x32xf32>
    %47 = arith.subf %46, %32 : vector<6x32xf32>
    %48 = arith.mulf %47, %45 : vector<6x32xf32>
    %49 = arith.mulf %32, %4 : vector<6x32xf32>
    %50 = arith.addf %48, %49 : vector<6x32xf32>
    %51 = arith.truncf %50 : vector<6x32xf32> to vector<6x32xbf16>
    %52 = vector.extract_strided_slice %51 {offsets = [0, 0], sizes = [3, 32], strides = [1, 1]} : vector<6x32xbf16> to vector<3x32xbf16>
    %53 = vector.shape_cast %52 : vector<3x32xbf16> to vector<1x3x32xbf16>
    %54 = vector.extract_strided_slice %51 {offsets = [3, 0], sizes = [3, 32], strides = [1, 1]} : vector<6x32xbf16> to vector<3x32xbf16>
    %55 = vector.shape_cast %54 : vector<3x32xbf16> to vector<1x3x32xbf16>
    %56 = tpu.concatenate %53, %55 in 0 : vector<1x3x32xbf16>, vector<1x3x32xbf16> -> vector<2x3x32xbf16>
    %c0_32 = arith.constant 0 : index
    %c0_33 = arith.constant 0 : index
    %c0_34 = arith.constant 0 : index
    %57 = vector.load %arg4[%c0_32, %c0_33, %c0_34] : memref<2x8x32xbf16, #tpu.memory_space<vmem>>, vector<2x8x32xbf16>
    %c0_35 = arith.constant 0 : index
    %c0_36 = arith.constant 0 : index
    %58 = vector.load %arg5[%c0_35, %c0_36] : memref<2x8xf32, #tpu.memory_space<vmem>>, vector<2x8xf32>
    %cst_37 = arith.constant dense<0.000000e+00> : vector<2x3x8xf32>
    %59 = tpu.matmul %56, %57, %cst_37 {dimension_numbers = #tpu.dot_dimension_numbers<[2], [2], [1], [1], [0, 0, 0, 1, 1, 1], [0], [0]>} : vector<2x3x32xbf16>, vector<2x8x32xbf16>, vector<2x3x8xf32> -> vector<2x3x8xf32>
    %60 = vector.shape_cast %58 : vector<2x8xf32> to vector<2x1x8xf32>
    %61 = vector.broadcast %60 : vector<2x1x8xf32> to vector<2x3x8xf32>
    %62 = arith.addf %59, %61 : vector<2x3x8xf32>
    %cst_38 = arith.constant dense<0xFF800000> : vector<2x3xf32>
    %63 = vector.multi_reduction <maximumf>, %62, %cst_38 [2] : vector<2x3x8xf32> to vector<2x3xf32>
    %64 = vector.shape_cast %63 : vector<2x3xf32> to vector<2x3x1xf32>
    %65 = vector.broadcast %64 : vector<2x3x1xf32> to vector<2x3x8xf32>
    %66 = arith.subf %62, %65 : vector<2x3x8xf32>
    %67 = math.exp %66 : vector<2x3x8xf32>
    %cst_39 = arith.constant dense<0.000000e+00> : vector<2x3xf32>
    %68 = vector.multi_reduction <add>, %67, %cst_39 [2] : vector<2x3x8xf32> to vector<2x3xf32>
    %69 = vector.shape_cast %68 : vector<2x3xf32> to vector<2x3x1xf32>
    %70 = tpu.reciprocal %69 {approx = true} : vector<2x3x1xf32> -> vector<2x3x1xf32>
    %71 = vector.broadcast %70 : vector<2x3x1xf32> to vector<2x3x8xf32>
    %72 = arith.mulf %67, %71 : vector<2x3x8xf32>
    %73 = arith.truncf %72 : vector<2x3x8xf32> to vector<2x3x8xbf16>
    %cst_40 = arith.constant dense<0.000000e+00> : vector<2x3x32xf32>
    %74 = tpu.matmul %73, %57, %cst_40 {dimension_numbers = #tpu.dot_dimension_numbers<[2], [1], [1], [2], [0, 0, 0, 1, 1, 2], [0], [0]>} : vector<2x3x8xbf16>, vector<2x8x32xbf16>, vector<2x3x32xf32> -> vector<2x3x32xf32>
    %75 = vector.extract_strided_slice %74 {offsets = [0, 0, 0], sizes = [1, 3, 32], strides = [1, 1, 1]} : vector<2x3x32xf32> to vector<1x3x32xf32>
    %76 = vector.shape_cast %75 : vector<1x3x32xf32> to vector<3x32xf32>
    %77 = vector.extract_strided_slice %74 {offsets = [1, 0, 0], sizes = [1, 3, 32], strides = [1, 1, 1]} : vector<2x3x32xf32> to vector<1x3x32xf32>
    %78 = vector.shape_cast %77 : vector<1x3x32xf32> to vector<3x32xf32>
    %79 = tpu.concatenate %76, %78 in 0 : vector<3x32xf32>, vector<3x32xf32> -> vector<6x32xf32>
    %c0_41 = arith.constant 0 : index
    %c0_42 = arith.constant 0 : index
    %c0_43 = arith.constant 0 : index
    %80 = vector.load %arg6[%c0_41, %c0_42, %c0_43] : memref<2x6x32xbf16, #tpu.memory_space<vmem>>, vector<2x6x32xbf16>
    %c0_44 = arith.constant 0 : index
    %c0_45 = arith.constant 0 : index
    %81 = vector.load %arg7[%c0_44, %c0_45] : memref<2x6xf32, #tpu.memory_space<vmem>>, vector<2x6xf32>
    %cst_46 = arith.constant dense<0.000000e+00> : vector<2x3x6xf32>
    %82 = tpu.matmul %56, %80, %cst_46 {dimension_numbers = #tpu.dot_dimension_numbers<[2], [2], [1], [1], [0, 0, 0, 1, 1, 1], [0], [0]>} : vector<2x3x32xbf16>, vector<2x6x32xbf16>, vector<2x3x6xf32> -> vector<2x3x6xf32>
    %83 = vector.shape_cast %81 : vector<2x6xf32> to vector<2x1x6xf32>
    %84 = vector.broadcast %83 : vector<2x1x6xf32> to vector<2x3x6xf32>
    %85 = arith.addf %82, %84 : vector<2x3x6xf32>
    %cst_47 = arith.constant dense<0xFF800000> : vector<2x3xf32>
    %86 = vector.multi_reduction <maximumf>, %85, %cst_47 [2] : vector<2x3x6xf32> to vector<2x3xf32>
    %87 = vector.shape_cast %86 : vector<2x3xf32> to vector<2x3x1xf32>
    %88 = vector.broadcast %87 : vector<2x3x1xf32> to vector<2x3x6xf32>
    %89 = arith.subf %85, %88 : vector<2x3x6xf32>
    %90 = math.exp %89 : vector<2x3x6xf32>
    %cst_48 = arith.constant dense<0.000000e+00> : vector<2x3xf32>
    %91 = vector.multi_reduction <add>, %90, %cst_48 [2] : vector<2x3x6xf32> to vector<2x3xf32>
    %92 = vector.shape_cast %91 : vector<2x3xf32> to vector<2x3x1xf32>
    %93 = tpu.reciprocal %92 {approx = true} : vector<2x3x1xf32> -> vector<2x3x1xf32>
    %94 = vector.broadcast %93 : vector<2x3x1xf32> to vector<2x3x6xf32>
    %95 = arith.mulf %90, %94 : vector<2x3x6xf32>
    %96 = arith.truncf %95 : vector<2x3x6xf32> to vector<2x3x6xbf16>
    %cst_49 = arith.constant dense<0.000000e+00> : vector<2x3x32xf32>
    %97 = tpu.matmul %96, %80, %cst_49 {dimension_numbers = #tpu.dot_dimension_numbers<[2], [1], [1], [2], [0, 0, 0, 1, 1, 2], [0], [0]>} : vector<2x3x6xbf16>, vector<2x6x32xbf16>, vector<2x3x32xf32> -> vector<2x3x32xf32>
    %98 = vector.extract_strided_slice %97 {offsets = [0, 0, 0], sizes = [1, 3, 32], strides = [1, 1, 1]} : vector<2x3x32xf32> to vector<1x3x32xf32>
    %99 = vector.shape_cast %98 : vector<1x3x32xf32> to vector<3x32xf32>
    %100 = vector.extract_strided_slice %97 {offsets = [1, 0, 0], sizes = [1, 3, 32], strides = [1, 1, 1]} : vector<2x3x32xf32> to vector<1x3x32xf32>
    %101 = vector.shape_cast %100 : vector<1x3x32xf32> to vector<3x32xf32>
    %102 = tpu.concatenate %99, %101 in 0 : vector<3x32xf32>, vector<3x32xf32> -> vector<6x32xf32>
    %103 = arith.truncf %79 : vector<6x32xf32> to vector<6x32xbf16>
    %104 = arith.truncf %102 : vector<6x32xf32> to vector<6x32xbf16>
    %c0_50 = arith.constant 0 : index
    %c0_51 = arith.constant 0 : index
    %105 = vector.load %arg22[%c0_50, %c0_51] : memref<32x6xbf16, #tpu.memory_space<vmem>>, vector<32x6xbf16>
    %cst_52 = arith.constant dense<0.000000e+00> : vector<6x6xf32>
    %106 = tpu.matmul %103, %105, %cst_52 {dimension_numbers = #tpu.dot_dimension_numbers<[1], [0], [0], [1], [0, 0, 1, 1], [], []>} : vector<6x32xbf16>, vector<32x6xbf16>, vector<6x6xf32> -> vector<6x6xf32>
    %c0_i32_53 = arith.constant 0 : i32
    %107 = arith.cmpi eq, %arg1, %c0_i32_53 : i32
    %108 = arith.extui %107 : i1 to i32
    %c0_i32_54 = arith.constant 0 : i32
    %109 = arith.cmpi ne, %108, %c0_i32_54 : i32
    scf.if %109 {
      %190 = vector.extract_strided_slice %106 {offsets = [0, 3], sizes = [6, 3], strides = [1, 1]} : vector<6x6xf32> to vector<6x3xf32>
      %c0_93 = arith.constant 0 : index
      %c0_94 = arith.constant 0 : index
      %191 = vector.load %arg26[%c0_93, %c0_94] : memref<1x3xf32, #tpu.memory_space<vmem>>, vector<1x3xf32>
      %192 = vector.broadcast %191 : vector<1x3xf32> to vector<6x3xf32>
      %193 = arith.addf %190, %192 : vector<6x3xf32>
      %c0_95 = arith.constant 0 : index
      %c0_96 = arith.constant 0 : index
      %194 = vector.load %arg28[%c0_95, %c0_96] : memref<6x3xf32, #tpu.memory_space<vmem>>, vector<6x3xf32>
      tpu.vector_store %arg28[%c0_95, %c0_96], %193 {strides = array<i32>} : memref<6x3xf32, #tpu.memory_space<vmem>>, vector<6x3xf32>,
    } else {
    }
    %c0_55 = arith.constant 0 : index
    %c0_56 = arith.constant 0 : index
    %110 = vector.load %arg21[%c0_55, %c0_56] : memref<32x3xbf16, #tpu.memory_space<vmem>>, vector<32x3xbf16>
    %cst_57 = arith.constant dense<0.000000e+00> : vector<6x3xf32>
    %111 = tpu.matmul %51, %110, %cst_57 {dimension_numbers = #tpu.dot_dimension_numbers<[1], [0], [0], [1], [0, 0, 1, 1], [], []>} : vector<6x32xbf16>, vector<32x3xbf16>, vector<6x3xf32> -> vector<6x3xf32>
    %112 = vector.extract_strided_slice %106 {offsets = [0, 0], sizes = [6, 3], strides = [1, 1]} : vector<6x6xf32> to vector<6x3xf32>
    %113 = arith.addf %111, %112 : vector<6x3xf32>
    %c0_58 = arith.constant 0 : index
    %c0_59 = arith.constant 0 : index
    %114 = vector.load %arg23[%c0_58, %c0_59] : memref<32x3xbf16, #tpu.memory_space<vmem>>, vector<32x3xbf16>
    %cst_60 = arith.constant dense<0.000000e+00> : vector<6x3xf32>
    %115 = tpu.matmul %104, %114, %cst_60 {dimension_numbers = #tpu.dot_dimension_numbers<[1], [0], [0], [1], [0, 0, 1, 1], [], []>} : vector<6x32xbf16>, vector<32x3xbf16>, vector<6x3xf32> -> vector<6x3xf32>
    %116 = arith.addf %113, %115 : vector<6x3xf32>
    %c0_61 = arith.constant 0 : index
    %c0_62 = arith.constant 0 : index
    %117 = vector.load %arg24[%c0_61, %c0_62] : memref<32x3xbf16, #tpu.memory_space<vmem>>, vector<32x3xbf16>
    %cst_63 = arith.constant dense<0.000000e+00> : vector<6x3xf32>
    %118 = tpu.matmul %5, %117, %cst_63 {dimension_numbers = #tpu.dot_dimension_numbers<[1], [0], [0], [1], [0, 0, 1, 1], [], []>} : vector<6x32xbf16>, vector<32x3xbf16>, vector<6x3xf32> -> vector<6x3xf32>
    %119 = arith.addf %116, %118 : vector<6x3xf32>
    %c0_64 = arith.constant 0 : index
    %c0_65 = arith.constant 0 : index
    %120 = vector.load %arg25[%c0_64, %c0_65] : memref<1x3xf32, #tpu.memory_space<vmem>>, vector<1x3xf32>
    %121 = vector.broadcast %120 : vector<1x3xf32> to vector<6x3xf32>
    %122 = arith.addf %119, %121 : vector<6x3xf32>
    %cst_66 = arith.constant dense<0xFF800000> : vector<6xf32>
    %123 = vector.multi_reduction <maximumf>, %122, %cst_66 [1] : vector<6x3xf32> to vector<6xf32>
    %124 = vector.shape_cast %123 : vector<6xf32> to vector<6x1xf32>
    %125 = vector.broadcast %124 : vector<6x1xf32> to vector<6x3xf32>
    %126 = arith.subf %122, %125 : vector<6x3xf32>
    %127 = math.exp %126 : vector<6x3xf32>
    %cst_67 = arith.constant dense<0.000000e+00> : vector<6xf32>
    %128 = vector.multi_reduction <add>, %127, %cst_67 [1] : vector<6x3xf32> to vector<6xf32>
    %129 = vector.shape_cast %128 : vector<6xf32> to vector<6x1xf32>
    %130 = tpu.reciprocal %129 {approx = true} : vector<6x1xf32> -> vector<6x1xf32>
    %131 = vector.broadcast %130 : vector<6x1xf32> to vector<6x3xf32>
    %132 = arith.mulf %127, %131 : vector<6x3xf32>
    %c0_68 = arith.constant 0 : index
    %c0_69 = arith.constant 0 : index
    %133 = vector.load %arg10[%c0_68, %c0_69] : memref<64x32xbf16, #tpu.memory_space<vmem>>, vector<64x32xbf16>
    %cst_70 = arith.constant dense<0.000000e+00> : vector<6x64xf32>
    %134 = tpu.matmul %51, %133, %cst_70 {dimension_numbers = #tpu.dot_dimension_numbers<[1], [1], [0], [0], [0, 0, 1, 0], [], []>} : vector<6x32xbf16>, vector<64x32xbf16>, vector<6x64xf32> -> vector<6x64xf32>
    %cst_71 = arith.constant dense<0xFF800000> : vector<6xf32>
    %135 = vector.multi_reduction <maximumf>, %134, %cst_71 [1] : vector<6x64xf32> to vector<6xf32>
    %136 = vector.shape_cast %135 : vector<6xf32> to vector<6x1xf32>
    %137 = vector.broadcast %136 : vector<6x1xf32> to vector<6x64xf32>
    %138 = arith.subf %134, %137 : vector<6x64xf32>
    %139 = math.exp %138 : vector<6x64xf32>
    %cst_72 = arith.constant dense<0.000000e+00> : vector<6xf32>
    %140 = vector.multi_reduction <add>, %139, %cst_72 [1] : vector<6x64xf32> to vector<6xf32>
    %141 = vector.shape_cast %140 : vector<6xf32> to vector<6x1xf32>
    %142 = tpu.reciprocal %141 {approx = true} : vector<6x1xf32> -> vector<6x1xf32>
    %143 = vector.broadcast %142 : vector<6x1xf32> to vector<6x64xf32>
    %144 = arith.mulf %139, %143 : vector<6x64xf32>
    %145 = vector.extract_strided_slice %132 {offsets = [0, 0], sizes = [6, 1], strides = [1, 1]} : vector<6x3xf32> to vector<6x1xf32>
    %146 = vector.broadcast %145 : vector<6x1xf32> to vector<6x64xf32>
    %147 = arith.mulf %146, %144 : vector<6x64xf32>
    %c0_73 = arith.constant 0 : index
    %c0_74 = arith.constant 0 : index
    %c0_75 = arith.constant 0 : index
    %148 = vector.load %arg9[%c0_73, %c0_74, %c0_75] : memref<2x6x64xbf16, #tpu.memory_space<vmem>>, vector<2x6x64xbf16>
    %cst_76 = arith.constant dense<0.000000e+00> : vector<2x3x64xf32>
    %149 = tpu.matmul %96, %148, %cst_76 {dimension_numbers = #tpu.dot_dimension_numbers<[2], [1], [1], [2], [0, 0, 0, 1, 1, 2], [0], [0]>} : vector<2x3x6xbf16>, vector<2x6x64xbf16>, vector<2x3x64xf32> -> vector<2x3x64xf32>
    %150 = vector.extract_strided_slice %149 {offsets = [0, 0, 0], sizes = [1, 3, 64], strides = [1, 1, 1]} : vector<2x3x64xf32> to vector<1x3x64xf32>
    %151 = vector.shape_cast %150 : vector<1x3x64xf32> to vector<3x64xf32>
    %152 = vector.extract_strided_slice %149 {offsets = [1, 0, 0], sizes = [1, 3, 64], strides = [1, 1, 1]} : vector<2x3x64xf32> to vector<1x3x64xf32>
    %153 = vector.shape_cast %152 : vector<1x3x64xf32> to vector<3x64xf32>
    %154 = tpu.concatenate %151, %153 in 0 : vector<3x64xf32>, vector<3x64xf32> -> vector<6x64xf32>
    %155 = vector.extract_strided_slice %132 {offsets = [0, 1], sizes = [6, 1], strides = [1, 1]} : vector<6x3xf32> to vector<6x1xf32>
    %156 = vector.broadcast %155 : vector<6x1xf32> to vector<6x64xf32>
    %157 = arith.mulf %156, %154 : vector<6x64xf32>
    %158 = arith.addf %147, %157 : vector<6x64xf32>
    %c0_77 = arith.constant 0 : index
    %c0_78 = arith.constant 0 : index
    %c0_79 = arith.constant 0 : index
    %159 = vector.load %arg8[%c0_77, %c0_78, %c0_79] : memref<2x8x64xbf16, #tpu.memory_space<vmem>>, vector<2x8x64xbf16>
    %cst_80 = arith.constant dense<0.000000e+00> : vector<2x3x64xf32>
    %160 = tpu.matmul %73, %159, %cst_80 {dimension_numbers = #tpu.dot_dimension_numbers<[2], [1], [1], [2], [0, 0, 0, 1, 1, 2], [0], [0]>} : vector<2x3x8xbf16>, vector<2x8x64xbf16>, vector<2x3x64xf32> -> vector<2x3x64xf32>
    %161 = vector.extract_strided_slice %160 {offsets = [0, 0, 0], sizes = [1, 3, 64], strides = [1, 1, 1]} : vector<2x3x64xf32> to vector<1x3x64xf32>
    %162 = vector.shape_cast %161 : vector<1x3x64xf32> to vector<3x64xf32>
    %163 = vector.extract_strided_slice %160 {offsets = [1, 0, 0], sizes = [1, 3, 64], strides = [1, 1, 1]} : vector<2x3x64xf32> to vector<1x3x64xf32>
    %164 = vector.shape_cast %163 : vector<1x3x64xf32> to vector<3x64xf32>
    %165 = tpu.concatenate %162, %164 in 0 : vector<3x64xf32>, vector<3x64xf32> -> vector<6x64xf32>
    %166 = vector.extract_strided_slice %132 {offsets = [0, 2], sizes = [6, 1], strides = [1, 1]} : vector<6x3xf32> to vector<6x1xf32>
    %167 = vector.broadcast %166 : vector<6x1xf32> to vector<6x64xf32>
    %168 = arith.mulf %167, %165 : vector<6x64xf32>
    %169 = arith.addf %158, %168 : vector<6x64xf32>
    %170 = vector.shape_cast %169 : vector<6x64xf32> to vector<1x6x64xf32>
    %c0_81 = arith.constant 0 : index
    %c0_82 = arith.constant 0 : index
    %c0_83 = arith.constant 0 : index
    %171 = vector.load %arg27[%c0_81, %c0_82, %c0_83] : memref<1x6x64xf32, #tpu.memory_space<vmem>>, vector<1x6x64xf32>
    tpu.vector_store %arg27[%c0_81, %c0_82, %c0_83], %170 {strides = array<i32>} : memref<1x6x64xf32, #tpu.memory_space<vmem>>, vector<1x6x64xf32>,
    %172 = tpu.iota {dimensions = array<i32: 1>} : vector<6x64xi32>
    %cst_84 = arith.constant dense<0xFF800000> : vector<6xf32>
    %173 = vector.multi_reduction <maximumf>, %169, %cst_84 [1] : vector<6x64xf32> to vector<6xf32>
    %174 = vector.shape_cast %173 : vector<6xf32> to vector<6x1xf32>
    %175 = vector.broadcast %174 : vector<6x1xf32> to vector<6x64xf32>
    %176 = arith.cmpf oeq, %169, %175 : vector<6x64xf32>
    %c64_i32 = arith.constant 64 : i32
    %177 = vector.broadcast %c64_i32 : i32 to vector<6x64xi32>
    %178 = arith.select %176, %172, %177 : vector<6x64xi1>, vector<6x64xi32>
    %cst_85 = arith.constant dense<2147483647> : vector<6xi32>
    %179 = vector.multi_reduction <minsi>, %178, %cst_85 [1] : vector<6x64xi32> to vector<6xi32>
    %180 = vector.shape_cast %179 : vector<6xi32> to vector<6x1xi32>
    %181 = vector.broadcast %180 : vector<6x1xi32> to vector<6x64xi32>
    %182 = arith.cmpi eq, %172, %181 : vector<6x64xi32>
    %183 = arith.extui %182 : vector<6x64xi1> to vector<6x64xi32>
    %184 = arith.sitofp %183 : vector<6x64xi32> to vector<6x64xf32>
    %185 = arith.truncf %184 : vector<6x64xf32> to vector<6x64xbf16>
    %c0_86 = arith.constant 0 : index
    %c0_87 = arith.constant 0 : index
    %186 = vector.load %arg10[%c0_86, %c0_87] : memref<64x32xbf16, #tpu.memory_space<vmem>>, vector<64x32xbf16>
    %cst_88 = arith.constant dense<0.000000e+00> : vector<6x32xf32>
    %187 = tpu.matmul %185, %186, %cst_88 {dimension_numbers = #tpu.dot_dimension_numbers<[1], [0], [0], [1], [0, 0, 1, 1], [], []>} : vector<6x64xbf16>, vector<64x32xbf16>, vector<6x32xf32> -> vector<6x32xf32>
    %c0_89 = arith.constant 0 : index
    %c0_90 = arith.constant 0 : index
    %188 = vector.load %arg30[%c0_89, %c0_90] : memref<6x32xf32, #tpu.memory_space<vmem>>, vector<6x32xf32>
    tpu.vector_store %arg30[%c0_89, %c0_90], %187 {strides = array<i32>} : memref<6x32xf32, #tpu.memory_space<vmem>>, vector<6x32xf32>,
    %c0_91 = arith.constant 0 : index
    %c0_92 = arith.constant 0 : index
    %189 = vector.load %arg29[%c0_91, %c0_92] : memref<6x32xf32, #tpu.memory_space<vmem>>, vector<6x32xf32>
    tpu.vector_store %arg29[%c0_91, %c0_92], %50 {strides = array<i32>} : memref<6x32xf32, #tpu.memory_space<vmem>>, vector<6x32xf32>,
    return
  }
  func.func @transform_0(%arg0: i32, %arg1: i32) -> (i32, i32) {
    %c0_i32 = arith.constant 0 : i32
    %c0_i32_0 = arith.constant 0 : i32
    return %arg0, %c0_i32 : i32, i32
  }
  func.func @transform_1(%arg0: i32, %arg1: i32) -> (i32, i32) {
    %c0_i32 = arith.constant 0 : i32
    %c0_i32_0 = arith.constant 0 : i32
    return %arg0, %c0_i32 : i32, i32
  }
  func.func @transform_2(%arg0: i32, %arg1: i32) -> (i32, i32, i32) {
    %c0_i32 = arith.constant 0 : i32
    %c0_i32_0 = arith.constant 0 : i32
    %c0_i32_1 = arith.constant 0 : i32
    return %arg0, %c0_i32, %c0_i32_0 : i32, i32, i32
  }
  func.func @transform_3(%arg0: i32, %arg1: i32) -> (i32, i32) {
    %c0_i32 = arith.constant 0 : i32
    %c0_i32_0 = arith.constant 0 : i32
    return %arg0, %c0_i32 : i32, i32
  }
  func.func @transform_4(%arg0: i32, %arg1: i32) -> (i32, i32, i32) {
    %c0_i32 = arith.constant 0 : i32
    %c0_i32_0 = arith.constant 0 : i32
    %c0_i32_1 = arith.constant 0 : i32
    return %arg0, %c0_i32, %c0_i32_0 : i32, i32, i32
  }
  func.func @transform_5(%arg0: i32, %arg1: i32) -> (i32, i32) {
    %c0_i32 = arith.constant 0 : i32
    %c0_i32_0 = arith.constant 0 : i32
    return %arg0, %c0_i32 : i32, i32
  }
  func.func @transform_6(%arg0: i32, %arg1: i32) -> (i32, i32, i32) {
    %c0_i32 = arith.constant 0 : i32
    %c0_i32_0 = arith.constant 0 : i32
    %c0_i32_1 = arith.constant 0 : i32
    return %arg0, %c0_i32, %c0_i32_0 : i32, i32, i32
  }
  func.func @transform_7(%arg0: i32, %arg1: i32) -> (i32, i32, i32) {
    %c0_i32 = arith.constant 0 : i32
    %c0_i32_0 = arith.constant 0 : i32
    %c0_i32_1 = arith.constant 0 : i32
    return %arg0, %c0_i32, %c0_i32_0 : i32, i32, i32
  }
  func.func @transform_8(%arg0: i32, %arg1: i32) -> (i32, i32) {
    %c0_i32 = arith.constant 0 : i32
    %c0_i32_0 = arith.constant 0 : i32
    %c0_i32_1 = arith.constant 0 : i32
    return %c0_i32, %c0_i32_0 : i32, i32
  }
  func.func @transform_9(%arg0: i32, %arg1: i32) -> (i32, i32) {
    %c0_i32 = arith.constant 0 : i32
    %c0_i32_0 = arith.constant 0 : i32
    %c0_i32_1 = arith.constant 0 : i32
    return %c0_i32, %c0_i32_0 : i32, i32
  }
  func.func @transform_10(%arg0: i32, %arg1: i32) -> (i32, i32) {
    %c0_i32 = arith.constant 0 : i32
    %c0_i32_0 = arith.constant 0 : i32
    %c0_i32_1 = arith.constant 0 : i32
    return %c0_i32, %c0_i32_0 : i32, i32
  }
  func.func @transform_11(%arg0: i32, %arg1: i32) -> (i32, i32) {
    %c0_i32 = arith.constant 0 : i32
    %c0_i32_0 = arith.constant 0 : i32
    %c0_i32_1 = arith.constant 0 : i32
    return %c0_i32, %c0_i32_0 : i32, i32
  }
  func.func @transform_12(%arg0: i32, %arg1: i32) -> (i32, i32) {
    %c0_i32 = arith.constant 0 : i32
    %c0_i32_0 = arith.constant 0 : i32
    %c0_i32_1 = arith.constant 0 : i32
    return %c0_i32, %c0_i32_0 : i32, i32
  }
  func.func @transform_13(%arg0: i32, %arg1: i32) -> (i32, i32) {
    %c0_i32 = arith.constant 0 : i32
    %c0_i32_0 = arith.constant 0 : i32
    %c0_i32_1 = arith.constant 0 : i32
    return %c0_i32, %c0_i32_0 : i32, i32
  }
  func.func @transform_14(%arg0: i32, %arg1: i32) -> (i32, i32) {
    %c0_i32 = arith.constant 0 : i32
    %c0_i32_0 = arith.constant 0 : i32
    %c0_i32_1 = arith.constant 0 : i32
    return %c0_i32, %c0_i32_0 : i32, i32
  }
  func.func @transform_15(%arg0: i32, %arg1: i32) -> (i32, i32) {
    %c0_i32 = arith.constant 0 : i32
    %c0_i32_0 = arith.constant 0 : i32
    %c0_i32_1 = arith.constant 0 : i32
    return %c0_i32, %c0_i32_0 : i32, i32
  }
  func.func @transform_16(%arg0: i32, %arg1: i32) -> (i32, i32) {
    %c0_i32 = arith.constant 0 : i32
    %c0_i32_0 = arith.constant 0 : i32
    %c0_i32_1 = arith.constant 0 : i32
    return %c0_i32, %c0_i32_0 : i32, i32
  }
  func.func @transform_17(%arg0: i32, %arg1: i32) -> (i32, i32) {
    %c0_i32 = arith.constant 0 : i32
    %c0_i32_0 = arith.constant 0 : i32
    %c0_i32_1 = arith.constant 0 : i32
    return %c0_i32, %c0_i32_0 : i32, i32
  }
  func.func @transform_18(%arg0: i32, %arg1: i32) -> (i32, i32) {
    %c0_i32 = arith.constant 0 : i32
    %c0_i32_0 = arith.constant 0 : i32
    %c0_i32_1 = arith.constant 0 : i32
    return %c0_i32, %c0_i32_0 : i32, i32
  }
  func.func @transform_19(%arg0: i32, %arg1: i32) -> (i32, i32) {
    %c0_i32 = arith.constant 0 : i32
    %c0_i32_0 = arith.constant 0 : i32
    %c0_i32_1 = arith.constant 0 : i32
    return %c0_i32, %c0_i32_0 : i32, i32
  }
  func.func @transform_20(%arg0: i32, %arg1: i32) -> (i32, i32) {
    %c0_i32 = arith.constant 0 : i32
    %c0_i32_0 = arith.constant 0 : i32
    %c0_i32_1 = arith.constant 0 : i32
    return %c0_i32, %c0_i32_0 : i32, i32
  }
  func.func @transform_21(%arg0: i32, %arg1: i32) -> (i32, i32) {
    %c0_i32 = arith.constant 0 : i32
    %c0_i32_0 = arith.constant 0 : i32
    %c0_i32_1 = arith.constant 0 : i32
    return %c0_i32, %c0_i32_0 : i32, i32
  }
  func.func @transform_22(%arg0: i32, %arg1: i32) -> (i32, i32) {
    %c0_i32 = arith.constant 0 : i32
    %c0_i32_0 = arith.constant 0 : i32
    %c0_i32_1 = arith.constant 0 : i32
    return %c0_i32, %c0_i32_0 : i32, i32
  }
  func.func @transform_23(%arg0: i32, %arg1: i32) -> (i32, i32) {
    %c0_i32 = arith.constant 0 : i32
    %c0_i32_0 = arith.constant 0 : i32
    %c0_i32_1 = arith.constant 0 : i32
    return %c0_i32, %c0_i32_0 : i32, i32
  }
  func.func @transform_24(%arg0: i32, %arg1: i32) -> (i32, i32) {
    %c0_i32 = arith.constant 0 : i32
    %c0_i32_0 = arith.constant 0 : i32
    %c0_i32_1 = arith.constant 0 : i32
    return %c0_i32, %c0_i32_0 : i32, i32
  }
  func.func @transform_25(%arg0: i32, %arg1: i32) -> (i32, i32, i32) {
    %c0_i32 = arith.constant 0 : i32
    %c0_i32_0 = arith.constant 0 : i32
    return %arg1, %arg0, %c0_i32 : i32, i32, i32
  }
  func.func @transform_26(%arg0: i32, %arg1: i32) -> (i32, i32) {
    %c0_i32 = arith.constant 0 : i32
    %c0_i32_0 = arith.constant 0 : i32
    return %arg0, %c0_i32 : i32, i32
  }
}

</mosaic_0001>

<bundles_post_ra>
// kernel: tpu_custom_call.1
= control target key start
LH: loop header
LB: loop body
LE: loop exit
PB: predicated region body
PF: predicated region fallthrough
CT: control target
= control target key end

     0   :  { %s3817_s0 = inlined_call_operand.vmem [shape: f32[6,32], index: 0, kind: input, shape index: {}]   ;;  %s3818_s1 = inlined_call_operand.vmem [shape: f32[6,32], index: 1, kind: input, shape index: {}]   ;;  %s3819_s2 = inlined_call_operand.vmem [shape: bf16[2,8,32], index: 2, kind: input, shape index: {}]   ;;  %s3820_s3 = inlined_call_operand.hbm [shape: f32[2,8], index: 3, kind: input, shape index: {}]   ;;  %s3821_s4 = inlined_call_operand.vmem [shape: bf16[2,6,32], index: 4, kind: input, shape index: {}]   ;;  %s3822_s5 = inlined_call_operand.vmem [shape: f32[2,6], index: 5, kind: input, shape index: {}]   ;;  %s3823_s6 = inlined_call_operand.vmem [shape: bf16[2,8,64], index: 6, kind: input, shape index: {}]   ;;  %s3824_s7 = inlined_call_operand.vmem [shape: bf16[2,6,64], index: 7, kind: input, shape index: {}]   ;;  %s3825_s8 = inlined_call_operand.vmem [shape: bf16[64,32], index: 8, kind: input, shape index: {}]   ;;  %s3826_s9 = inlined_call_operand.vmem [shape: bf16[32,32], index: 9, kind: input, shape index: {}]   ;;  %s3827_s10 = inlined_call_operand.vmem [shape: bf16[32,32], index: 10, kind: input, shape index: {}]   ;;  %s3828_s11 = inlined_call_operand.vmem [shape: bf16[32,32], index: 11, kind: input, shape index: {}]   ;;  %s3829_s12 = inlined_call_operand.vmem [shape: bf16[32,32], index: 12, kind: input, shape index: {}]   ;;  %s3830_s13 = inlined_call_operand.vmem [shape: bf16[32,32], index: 13, kind: input, shape index: {}]   ;;  %s3831_s14 = inlined_call_operand.vmem [shape: bf16[32,32], index: 14, kind: input, shape index: {}]   ;;  %s3832_s15 = inlined_call_operand.vmem [shape: f32[1,32], index: 15, kind: input, shape index: {}]   ;;  %s3833_s16 = inlined_call_operand.vmem [shape: f32[1,32], index: 16, kind: input, shape index: {}]   ;;  %s3834_s17 = inlined_call_operand.vmem [shape: f32[1,32], index: 17, kind: input, shape index: {}]   ;;  %s3835_s18 = inlined_call_operand.vmem [shape: f32[1,32], index: 18, kind: input, shape index: {}]   ;;  %s3836_s19 = inlined_call_operand.vmem [shape: bf16[32,3], index: 19, kind: input, shape index: {}]   ;;  %s3837_s20 = inlined_call_operand.vmem [shape: bf16[32,6], index: 20, kind: input, shape index: {}]   ;;  %s3838_s21 = inlined_call_operand.vmem [shape: bf16[32,3], index: 21, kind: input, shape index: {}]   ;;  %s3839_s22 = inlined_call_operand.vmem [shape: bf16[32,3], index: 22, kind: input, shape index: {}]   ;;  %s3840_s23 = inlined_call_operand.vmem [shape: f32[1,3], index: 23, kind: input, shape index: {}]   ;;  %s3841_s24 = inlined_call_operand.vmem [shape: f32[1,3], index: 24, kind: input, shape index: {}]   ;;  %s3842_s25 = inlined_call_operand.vmem [shape: f32[4,6,64], index: 25, kind: output, shape index: {0}]   ;;  %s3843_s26 = inlined_call_operand.vmem [shape: f32[6,3], index: 26, kind: output, shape index: {1}]  }
   0x1   :  { %3856 = sst [smem:[#allocation9_spill]] %s3817_s0 }
   0x2   :  { %3857 = sst [smem:[#allocation10_spill]] %s3818_s1 }
   0x3   :  { %3858 = sst [smem:[#allocation11_spill]] %s3819_s2 }
   0x4   :  { %3859 = sst [smem:[#allocation12_spill]] %s3820_s3 }
   0x5   :  { %3860 = sst [smem:[#allocation13_spill]] %s3821_s4 }
   0x6   :  { %3861 = sst [smem:[#allocation14_spill]] %s3822_s5 }
   0x7   :  { %3862 = sst [smem:[#allocation15_spill]] %s3823_s6 }
   0x8   :  { %3863 = sst [smem:[#allocation16_spill]] %s3824_s7 }
   0x9   :  { %3864 = sst [smem:[#allocation17_spill]] %s3825_s8 }
   0xa   :  { %3865 = sst [smem:[#allocation18_spill]] %s3826_s9 }
   0xb   :  { %3866 = sst [smem:[#allocation19_spill]] %s3827_s10 }
   0xc   :  { %32 = vsyncpa [#allocation5], 0  ;;  %s3377_s27 = smov 0   ;;  %s3379_s3 = smov 0  }
   0xd   :  { %s3381_s7 = smov 0  }
   0xe LB: > { %3867 = sst [smem:[#allocation7_spill]] %s3227_s3  ;;  %s2746_s28 = sadd.s32 4294967295, %s3231_s7   ;;  %s3231_s7 = sphi %s3381_s7, %s38_s7   ;;  %s3227_s3 = sphi %s3379_s3, %s3887_s3   ;;  %s3223_s27 = sphi %s3377_s27, %s3886_s27  }
   0xf   : > { %s47_s8 = sadd.s32 1, %s3227_s3  ;;  %p2748_p1 = scmp.ge.s32.totalorder %s3231_s7, 1 }
  0x10   : > { %p48_p0 = scmp.ge.s32.totalorder %s47_s8, 4  ;;  %p674_p2 = scmp.lt.s32.totalorder %s3231_s7, 5 }
  0x11   : > { %p3402_p4 = scmp.eq.s32.totalorder %s2746_s28, 0  ;;  %s3233_s0 = smov [#allocation4]  }
  0x12   : > { %s3889_s8 = smov (%p48_p0, %s47_s8), 0  ;;  %p3398_p3 = pnand %p2748_p1, %p674_p2 }
  0x13   : > { %3868 = sst [smem:[#allocation8_spill]] %s3889_s8  ;;  %s712_s9 = sshll.u32 %s3233_s0, 4  ;;  %s713_s9 = int_to_ptr.vmem [resolvable:$true] %s712_s9 }
  0x14   : > { %s3869_s4 = scalar_select %p3398_p3, 1, 0 }
  0x15   : > { %s3870_s29 = scalar_select %p3402_p4, 1, 0 }
  0x16   : > { %p3072_p5 = pneg %p3398_p3  ;;  %s3872_s10 = sld [smem:[#allocation12_spill]] }
  0x18   : > { %p3410_p6 = pnand %p3402_p4, %p3072_p5 }
  0x1a   : > { %p3179_p8 = pneg %p3410_p6 }
  0x1c   : > { %s3177_s6 = scalar_lea.hbm %s3872_s10, 32 }
  0x1d   : > { %p3178_p7 = scmp.ne.s32.totalorder %s3872_s10, %s3177_s6  ;;  %p3184_p11 = scmp.lt.u32.totalorder %s3177_s6, %s3872_s10 }
  0x1f   : > { %p3180_p9 = pnand %p3179_p8, %p3178_p7 }
  0x21   : > { %p3181_p10 = pneg %p3180_p9 }
  0x23   : > { %p3186_p12 = pnand %p3184_p11, %p3181_p10 }
  0x25   : > { %3189 = shalt.err (!%p3186_p12)
}
  0x26   : > { %s3190_s3 = scalar_lea.vmem %s713_s9, 32  ;;  %p3198_p2 = scmp.lt.s32.totalorder %s713_s9, %s713_s9 }
  0x27   : > { %p3191_p13 = scmp.ne.s32.totalorder %s713_s9, %s3190_s3  ;;  %p3199_p5 = scmp.lt.s32.totalorder %s3190_s3, %s3190_s3 }
  0x29   : > { %p3193_p0 = pnand %p3191_p13, %p3179_p8  ;;  %p3200_p4 = por %p3199_p5, %p3198_p2 }
  0x2b   : > { %p3194_p1 = pneg %p3193_p0 }
  0x2d   : > { %p3201_p3 = pnand %p3200_p4, %p3194_p1 }
  0x2f   : > { %3204 = shalt.err (!%p3201_p3)
}
  0x30   : > { %3075 = dma.hbm_to_vmem [thread:$0]  (!%p3410_p6), %s3872_s10, 32, %s713_s9, [#allocation5]  }
  0x31   : > { %p3873_p7 = scmp.ne.s32.totalorder %s3869_s4, 0 }
  0x32   : > { %p3874_p9 = scmp.ne.s32.totalorder (!%p3873_p7), %s3870_s29, 0 }
  0x33   : > { %810 = sbr.rel (%p3873_p7) target bundleno = 3098 (0xc1a), region = 120 }
  0x3a   : > { %3218 = dma.done.wait (%p3874_p9), [#allocation5], 32  }
  0x3b   : > { %3220 = vsyncadd (%p3874_p9), [#allocation5], 4294967264  ;;  %p949_p8 = scmp.lt.s32.totalorder %s3223_s27, 3  ;;  %p2760_p3 = scmp.ne.s32.totalorder %s3223_s27, 0 }
  0x3c   : > { %s3875_s28 = sld [smem:[#allocation9_spill]] (!%p2760_p3)  ;;  %vm966_vm0 = vcmask (!%p2760_p3), 259072   ;;  %s3876_s2 = sld [smem:[#allocation10_spill]] (!%p2760_p3) }
  0x3d   : > { %s950_s3 = scalar_select %p949_p8, %s3223_s27, 3 }
  0x3e   : > { %964 = sbr.rel (%p2760_p3) target bundleno = 69 (0x45), region = 128 }
  0x3f   : > { %s2759_s8 = sshll.u32 %s950_s3, 3 }
  0x40   : > { %s3441_s1 = scalar_lea.vmem %s3842_s25, %s2759_s8 }
  0x42   : > { %v965_v0 = vld [vmem:[%s3875_s28] sm:$0x3f] (!%p2760_p3) }
  0x43   : > { %v968_v1 = vld [vmem:[%s3876_s2] sm:$0x3f] (!%p2760_p3)  ;;  %967 = vst.msk [vmem:[#allocation2] sm:$0x3f] (!%p2760_p3), %vm966_vm0, %v965_v0 }
  0x44   : > { %969 = vst.msk [vmem:[#allocation3] sm:$0x3f] (!%p2760_p3), %vm966_vm0, %v968_v1 }
  0x45 PF: > { %v3111_v2 = vld [vmem:[%s3829_s12] sm:$0xff]   ;;  %v3234_v3 = vmov 0.0   ;;  %v3112_v4 = vld [vmem:[%s3829_s12 + $0x8] sm:$0xff]   ;;  %vm3235_vm1 = vmmov 0   ;;  %vm994_vm2 = vcmask 261120   ;;  %s3877_s29 = sld [smem:[#allocation18_spill]] }
  0x46   : > { %2892 = vmatprep.subr.bf16.mxu1 %v3234_v3  ;;  %2908 = vmatprep.subr.bf16.mxu0 %v3234_v3  ;;  %v3115_v7 = vld [vmem:[%s3830_s13] sm:$0xff]   ;;  %v3117_v9 = vld [vmem:[%s3830_s13 + $0x8] sm:$0xff]   ;;  %s3878_s9 = sld [smem:[#allocation19_spill]]  ;;  %vm1502_vm3 = vcmask 59392   ;;  %vm1531_vm4 = vcmask 1043456   ;;  %s3880_s6 = sld [smem:[#allocation13_spill]] }
  0x47   : > { %2893 = vmatpush3.bf16.msra.mxu1 %v3111_v2  ;;  %2896 = vmatprep.mubr.msk.bf16.mxu1 %vm3235_vm1, %v3234_v3  ;;  %v3119_v12 = vld [vmem:[%s3831_s14] sm:$0xff]   ;;  %v3121_v15 = vld [vmem:[%s3831_s14 + $0x8] sm:$0xff]   ;;  %s3879_s0 = sld [smem:[#allocation11_spill]]  ;;  %vm1527_vm5 = vcmask 64512   ;;  %s3881_s5 = sld [smem:[#allocation14_spill]]  ;;  %vm1622_vm6 = vcmask 1042432  }
  0x48   : > { %2894 = vmatprep.subr.bf16.mxu1 %v3234_v3  ;;  %2912 = vmatprep.mubr.msk.bf16.mxu0 %vm3235_vm1, %v3234_v3  ;;  %v3120_v17 = vld [vmem:[%s3828_s11] sm:$0xff]   ;;  %v3122_v18 = vld [vmem:[%s3828_s11 + $0x8] sm:$0xff]   ;;  %vm1746_vm7 = vcmask 43008   ;;  %vm1771_vm8 = vcmask 48128   ;;  %s3238_s3 = smov (!%p2760_p3), 125   ;;  %vm1944_vm9 = vcmask (!%p2760_p3), 21504  }
  0x49   : > { %2909 = vmatpush3.bf16.msra.mxu0 %v3115_v7  ;;  %v2767_v31 = vld [vmem:[%s3832_s15] ss:$0 sm:$0xff] }
  0x4a   : > { %v3462_v5 = vld [vmem:[#allocation2] sm:$0x3f]  ;;  %2910 = vmatprep.subr.bf16.mxu0 %v3234_v3 }
  0x4b   : > { %v973_v6 = vpack.c.bf16 %v3462_v5, %v3462_v5  ;;  %2895 = vmatpush3.bf16.msra.mxu1 %v3112_v4  ;;  %v3113_v8 = vld [vmem:[%s3877_s29] sm:$0xff]   ;;  %v3114_v10 = vld [vmem:[%s3877_s29 + $0x8] sm:$0xff]  }
  0x4c   : > { %2900 = vmatprep.subr.bf16.mxu1 %v3234_v3  ;;  %v970_v11 = vld [vmem:[#allocation3] sm:$0x3f]  ;;  %v3116_v14 = vld [vmem:[%s3878_s9] sm:$0xff]  }
  0x4d   : > { %2911 = vmatpush3.bf16.msra.mxu0 %v3117_v9  ;;  %v3491_v13 = vpack.c.bf16 %v970_v11, %v970_v11  ;;  %v3118_v16 = vld [vmem:[%s3878_s9 + $0x8] sm:$0xff]   ;;  %v3536_v19 = vld [vmem:[%s3879_s0] sm:$0xf]  ;;  %v3543_v21 = vld [vmem:[%s3879_s0 + $0x4] sm:$0xf] }
  0x4e   : > { %2897 = vmatmul.mubr.msk.bf16.vlgmr.msra.gmra.mrb[0].mxu1 %vm994_vm2, %v973_v6  ;;  %2924 = vmatprep.subr.bf16.mxu0 %v3234_v3  ;;  %v1414_v20 = vsel %vm994_vm2, %v3536_v19, 0  ;;  %v1460_v22 = vsel %vm994_vm2, %v3543_v21, 0  ;;  %v2775_v43 = vld [vmem:[%s3833_s16] ss:$0 sm:$0xff] }
  0x4f   : > { %2901 = vmatpush3.bf16.msra.mxu1 %v3113_v8  ;;  %2904 = vmatprep.mubr.msk.bf16.mxu1 %vm3235_vm1, %v3234_v3  ;;  %v2777_v57 = vld [vmem:[%s3835_s18] ss:$0 sm:$0xff] }
  0x50   : > { %2902 = vmatprep.subr.bf16.mxu1 %v3234_v3  ;;  %2913 = vmatmul.mubr.msk.bf16.vlgmr.msra.gmra.mrb[0].mxu0 %vm994_vm2, %v973_v6  ;;  %v2781_v60 = vld [vmem:[%s3834_s17] ss:$0 sm:$0xff] }
  0x51   : > { %2925 = vmatpush3.bf16.msra.mxu0 %v3119_v12  ;;  %2928 = vmatprep.mubr.msk.bf16.mxu0 %vm3235_vm1, %v3234_v3 }
  0x52   : > { %2926 = vmatprep.subr.bf16.mxu0 %v3234_v3 }
  0x53   : > { %2903 = vmatpush3.bf16.msra.mxu1 %v3114_v10 }
  0x54   : > { %2916 = vmatprep.subr.bf16.mxu1 %v3234_v3 }
  0x55   : > { %2927 = vmatpush3.bf16.msra.mxu0 %v3121_v15 }
  0x56   : > { %2905 = vmatmul.mubr.msk.bf16.vlgmr.msra.gmra.mrb[4].mxu1 %vm994_vm2, %v3491_v13  ;;  %2940 = vmatprep.subr.bf16.mxu0 %v3234_v3 }
  0x57   : > { %2917 = vmatpush3.bf16.msra.mxu1 %v3116_v14  ;;  %2920 = vmatprep.mubr.msk.bf16.mxu1 %vm3235_vm1, %v3234_v3 }
  0x58   : > { %2918 = vmatprep.subr.bf16.mxu1 %v3234_v3  ;;  %2929 = vmatmul.mubr.msk.bf16.vlgmr.msra.gmra.mrb[4].mxu0 %vm994_vm2, %v973_v6 }
  0x59   : > { %2942 = vmatprep.mubr.msk.bf16.mxu0 %vm3235_vm1, %v3234_v3 }
  0x5b   : > { %2919 = vmatpush3.bf16.msra.mxu1 %v3118_v16 }
  0x5c   : > { %2932 = vmatprep.subr.bf16.mxu1 %v3234_v3 }
  0x5e   : > { %2921 = vmatmul.mubr.msk.bf16.vlgmr.msra.gmra.mrb[8].mxu1 %vm994_vm2, %v3491_v13  ;;  %2941 = vmatpush3.bf16.xpose.msra.mxu0 %v1414_v20 }
  0x5f   : > { %2933 = vmatpush3.bf16.msra.mxu1 %v3120_v17  ;;  %2936 = vmatprep.mubr.msk.bf16.mxu1 %vm3235_vm1, %v3234_v3 }
  0x60   : > { %2934 = vmatprep.subr.bf16.mxu1 %v3234_v3  ;;  %2952 = vmatprep.subr.bf16.mxu0 %v3234_v3 }
  0x63   : > { %2935 = vmatpush3.bf16.msra.mxu1 %v3122_v18  ;;  %v1390_v18 = vlaneseq }
  0x64   : > { %2946 = vmatprep.subr.bf16.mxu1 %v3234_v3 }
  0x66   : > { %2937 = vmatmul.mubr.msk.bf16.vlgmr.msra.gmra.mrb[12].mxu1 %vm994_vm2, %v3491_v13 }
  0x67   : > { %2948 = vmatprep.mubr.msk.bf16.mxu1 %vm3235_vm1, %v3234_v3 }
  0x6c   : > { %2947 = vmatpush3.bf16.xpose.msra.mxu1 %v1460_v22  ;;  %v1391_v22 = vshrl.u32 %v1390_v18, 7 }
  0x6d   : > { %2958 = vmatprep.subr.bf16.mxu1 %v3234_v3 }
 0x121   : > { %v1032_v23 = vpop.f32.mrb[0].mxu1 }
 0x122   : > { %v2898_v24 = vpop.f32.mrb[1].mxu1 }
 0x123   : > { %v1035_v25 = vpop.f32.mrb[2].mxu1  ;;  %v1161_v27 = vpop.f32.mrb[0].mxu0  ;;  %v2785_v24 = vld.sshfl [vmem:[#allocation4] sm:$0x11 pattern:$0x75316420] }
 0x124   : > { %v2899_v26 = vpop.f32.mrb[3].mxu1  ;;  %v2914_v28 = vpop.f32.mrb[1].mxu0 }
 0x125   : > { %v1164_v29 = vpop.f32.mrb[2].mxu0  ;;  %v3584_v26 = vsub.s32 0, %v1391_v22 }
 0x126   : > { %v2915_v32 = vpop.f32.mrb[3].mxu0 }
 0x129   : > { %v1087_v30 = vpop.f32.mrb[4].mxu1 }
 0x12a   : > { %v1088_v33 = vadd.f32 %v1087_v30, %v1032_v23  ;;  %v2906_v34 = vpop.f32.mrb[5].mxu1 }
 0x12b   : > { %v1090_v35 = vpop.f32.mrb[6].mxu1  ;;  %v1290_v39 = vpop.f32.mrb[4].mxu0 }
 0x12c   : > { %v1100_v36 = vadd.f32 %v2767_v31, %v1088_v33  ;;  %v2907_v37 = vpop.f32.mrb[7].mxu1  ;;  %v2930_v40 = vpop.f32.mrb[5].mxu0  ;;  %v1291_v61 = vadd.f32 %v2777_v57, %v1290_v39 }
 0x12d   : > { %v1293_v41 = vpop.f32.mrb[6].mxu0 }
 0x12e   : > { %v2768_v38 = vmul.f32 -1.442695, %v1100_v36  ;;  %v2931_v44 = vpop.f32.mrb[7].mxu0 }
 0x130   : > { %3125 = vpow2.f32 %v2768_v38 }
 0x131   : > { %v1213_v42 = vpop.f32.mrb[8].mxu1 }
 0x132   : > { %v1214_v45 = vadd.f32 %v1213_v42, %v1161_v27  ;;  %v2922_v46 = vpop.f32.mrb[9].mxu1  ;;  %v1386_v27 = vcombine.high %v2785_v24, %v2785_v24 }
 0x133   : > { %v1216_v47 = vpop.f32.mrb[10].mxu1 }
 0x134   : > { %v1226_v48 = vadd.f32 %v2775_v43, %v1214_v45  ;;  %v2923_v49 = vpop.f32.mrb[11].mxu1 }
 0x136   : > { %v2776_v50 = vmul.f32 -1.442695, %v1226_v48 }
 0x138   : > { %3127 = vpow2.f32 %v2776_v50 }
 0x139   : > { %v1353_v51 = vpop.f32.mrb[12].mxu1 }
 0x13a   : > { %v3126_v52 = vpop.eup %3125  ;;  %v2938_v53 = vpop.f32.mrb[13].mxu1  ;;  %v1354_v62 = vadd.f32 %v2781_v60, %v1353_v51 }
 0x13b   : > { %v1104_v54 = vadd.f32 1.0, %v3126_v52  ;;  %v1356_v55 = vpop.f32.mrb[14].mxu1  ;;  %v1532_v53 = vsel %vm1531_vm4, %v3536_v19, 0 }
 0x13c   : > { %v2939_v56 = vpop.f32.mrb[15].mxu1 }
 0x13d   : > { %3129 = vrcp.f32 %v1104_v54  ;;  %v1577_v54 = vsel %vm1531_vm4, %v3543_v21, 0 }
 0x142   : > { %v3128_v58 = vpop.eup %3127 }
 0x143   : > { %v1230_v59 = vadd.f32 1.0, %v3128_v58  ;;  %v3602_v58 = vld [vmem:[%s3880_s6] sm:$0x7] }
 0x144   : > { %v1661_v21 = vsel %vm994_vm2, %v3602_v58, 0 }
 0x145   : > { %3131 = vrcp.f32 %v1230_v59 }
 0x147   : > { %v3130_v63 = vpop.eup %3129 }
 0x148   : > { %v1359_v0 = vmul.f32 %v3130_v63, %v1291_v61  ;;  %v1625_v61 = vld [vmem:[%s3880_s6 + $0x4] sm:$0x7] }
 0x14a   : > { %v1360_v1 = vadd.f32 %v1359_v0, %v1354_v62  ;;  %v1704_v0 = vsel %vm994_vm2, %v1625_v61, 0 }
 0x14c   : > { %3133 = vtanh.f32 %v1360_v1  ;;  %v2790_v1 = vld.sshfl [vmem:[%s3881_s5] sm:$0x11 pattern:$0x75316420]  ;;  %s3237_s5 = smov (!%p2760_p3), 3  }
 0x14f   : > { %v3132_v2 = vpop.eup %3131 }
 0x150   : > { %v1362_v4 = vsub.f32 1.0, %v3132_v2  ;;  %v1364_v8 = vmul.f32 %v3132_v2, %v3462_v5  ;;  %v3236_v5 = vmov 1966171168  }
 0x151   : > { %v1388_v17 = vunpack.c.l.s4 %v3236_v5 }
 0x153   : > { %v1389_v20 = vunpack.c.0.s8 %v1388_v17 }
 0x155   : > { %v3581_v23 = vsub.s32 %v1389_v20, %v1391_v22 }
 0x156   : > { %v3134_v6 = vpop.eup %3133 }
 0x157   : > { %v1363_v7 = vmul.f32 %v3134_v6, %v1362_v4  ;;  %v1393_v25 = vrot.slane %v2785_v24, %v3581_v23  ;;  %v1400_v29 = vrot.slane %v1386_v27, %v3581_v23  ;;  %v1642_v6 = vrot.slane %v2790_v1, %v3581_v23 }
 0x159   : > { %v3562_v9 = vadd.f32 %v1364_v8, %v1363_v7  ;;  %v1404_v28 = vrot.slane %v1393_v25, %v3584_v26  ;;  %v1408_v36 = vrot.slane %v1400_v29, %v3584_v26 }
 0x15b   : > { %v3566_v10 = vpack.c.bf16 %v3562_v9, %v3562_v9 }
 0x15d   : > { %2943 = vmatmul.mubr.msk.bf16.vlgmr.msra.gmra.mrb[8].mxu0 %vm994_vm2, %v3566_v10  ;;  %v1368_v11 = vshrl.u32 %v3566_v10, 16  ;;  %v1371_v12 = vshll.u32 %v3566_v10, 16 }
 0x15e   : > { %2954 = vmatprep.mubr.msk.bf16.mxu0 %vm3235_vm1, %v3234_v3  ;;  %2953 = vmatpush3.bf16.msra.mxu0 %v1532_v53 }
 0x15f   : > { %v1370_v14 = vrot.slane %v1368_v11, 1  ;;  %v1373_v15 = vrot.slane %v1371_v12, 2  ;;  %2964 = vmatprep.subr.bf16.mxu0 %v3234_v3  ;;  %v1635_v11 = vcombine.high %v2790_v1, %v2790_v1  ;;  %v1653_v12 = vrot.slane %v1642_v6, %v3584_v26 }
 0x161   : > { %v3574_v16 = vor.u32 %v1373_v15, %v1370_v14  ;;  %v1649_v5 = vrot.slane %v1635_v11, %v3581_v23 }
 0x163   : > { %2949 = vmatmul.mubr.msk.bf16.vlgmr.msra.gmra.mrb[16].mxu1 %vm994_vm2, %v3574_v16 }
 0x164   : > { %2960 = vmatprep.mubr.msk.bf16.mxu1 %vm3235_vm1, %v3234_v3  ;;  %2959 = vmatpush3.bf16.msra.mxu1 %v1577_v54 }
 0x165   : > { %2970 = vmatprep.subr.bf16.mxu1 %v3234_v3 }
 0x230   : > { %v1450_v30 = vpop.f32.mrb[8].mxu0 }
 0x231   : > { %v1451_v31 = vadd.f32 %v1450_v30, %v1404_v28  ;;  %v2944_v32 = vpop.f32.mrb[9].mxu0 }
 0x232   : > { %v1453_v33 = vpop.f32.mrb[10].mxu0 }
 0x233   : > { %v2945_v34 = vpop.f32.mrb[11].mxu0  ;;  %v1503_v35 = vsel %vm1502_vm3, %v1451_v31, -inf }
 0x234   : > { %1504 = vmax.xlane.f32.xlu0 %v1503_v35 }
 0x236   : > { %v1496_v37 = vpop.f32.mrb[16].mxu1 }
 0x237   : > { %v1497_v38 = vadd.f32 %v1496_v37, %v1408_v36  ;;  %v2950_v39 = vpop.f32.mrb[17].mxu1 }
 0x238   : > { %v1499_v40 = vpop.f32.mrb[18].mxu1 }
 0x239   : > { %v2951_v41 = vpop.f32.mrb[19].mxu1  ;;  %v1506_v42 = vsel %vm1502_vm3, %v1497_v38, -inf }
 0x23a   : > { %1507 = vmax.xlane.f32.xlu0 %v1506_v42 }
 0x2c1   : > { %v1505_v43 = vpop.xlane.xlu0 %1504 }
 0x2c2   : > { %v1509_v44 = vsub.f32 %v1451_v31, %v1505_v43  ;;  %v1657_v31 = vrot.slane %v1649_v5, %v3584_v26 }
 0x2c4   : > { %v1511_v45 = vmul.f32 1.442695, %v1509_v44 }
 0x2c6   : > { %3135 = vpow2.f32 %v1511_v45 }
 0x2c7   : > { %v1508_v46 = vpop.xlane.xlu0 %1507 }
 0x2c8   : > { %v1510_v47 = vsub.f32 %v1497_v38, %v1508_v46  ;;  %v1775_v46 = vsel %vm1622_vm6, %v3602_v58, 0 }
 0x2ca   : > { %v1513_v48 = vmul.f32 1.442695, %v1510_v47  ;;  %v1820_v47 = vsel %vm1622_vm6, %v1625_v61, 0 }
 0x2cc   : > { %3137 = vpow2.f32 %v1513_v48 }
 0x2d0   : > { %v3136_v49 = vpop.eup %3135 }
 0x2d1   : > { %v1515_v50 = vsel %vm1502_vm3, %v3136_v49, 0.0 }
 0x2d2   : > { %1516 = vadd.xlane.f32.xlu1 %v1515_v50 }
 0x2d6   : > { %v3138_v51 = vpop.eup %3137 }
 0x2d7   : > { %v1518_v52 = vsel %vm1502_vm3, %v3138_v51, 0.0 }
 0x2d8   : > { %1519 = vadd.xlane.f32.xlu1 %v1518_v52  ;;  %v3123_v52 = vld [vmem:[%s3837_s20] sm:$0xff]  }
 0x35f   : > { %v1517_v55 = vpop.xlane.xlu1 %1516 }
 0x360   : > { %3139 = vrcp.f32 %v1517_v55  ;;  %v3124_v55 = vld [vmem:[%s3837_s20 + $0x8] sm:$0xff]  }
 0x365   : > { %v1520_v56 = vpop.xlane.xlu1 %1519 }
 0x366   : > { %3141 = vrcp.f32 %v1520_v56 }
 0x36a   : > { %v3140_v57 = vpop.eup %3139 }
 0x36b   : > { %v1523_v19 = vmul.f32 %v3140_v57, %v3136_v49 }
 0x36d   : > { %v3604_v59 = vpack.c.bf16 %v1523_v19, %v1523_v19 }
 0x36f   : > { %2955 = vmatmul.mubr.msk.bf16.vlgmr.msra.gmra.mrb[12].mxu0 %vm1527_vm5, %v3604_v59 }
 0x370   : > { %v3142_v60 = vpop.eup %3141  ;;  %2965 = vmatpush3.bf16.xpose.msra.mxu0 %v1661_v21  ;;  %2966 = vmatprep.mubr.msk.bf16.mxu0 %vm3235_vm1, %v3234_v3 }
 0x371   : > { %v1524_v62 = vmul.f32 %v3142_v60, %v3138_v51  ;;  %2976 = vmatprep.subr.bf16.mxu0 %v3234_v3 }
 0x373   : > { %v3616_v63 = vpack.c.bf16 %v1524_v62, %v1524_v62 }
 0x375   : > { %2961 = vmatmul.mubr.msk.bf16.vlgmr.msra.gmra.mrb[20].mxu1 %vm1527_vm5, %v3616_v63 }
 0x376   : > { %2971 = vmatpush3.bf16.xpose.msra.mxu1 %v1704_v0  ;;  %2972 = vmatprep.mubr.msk.bf16.mxu1 %vm3235_vm1, %v3234_v3 }
 0x377   : > { %2967 = vmatmul.mubr.msk.bf16.vlgmr.msra.gmra.mrb[16].mxu0 %vm994_vm2, %v3566_v10  ;;  %2982 = vmatprep.subr.bf16.mxu1 %v3234_v3 }
 0x378   : > { %2978 = vmatprep.mubr.msk.bf16.mxu0 %vm3235_vm1, %v3234_v3  ;;  %2977 = vmatpush3.bf16.msra.mxu0 %v1775_v46 }
 0x379   : > { %2988 = vmatprep.subr.bf16.mxu0 %v3234_v3 }
 0x37d   : > { %2973 = vmatmul.mubr.msk.bf16.vlgmr.msra.gmra.mrb[24].mxu1 %vm994_vm2, %v3574_v16 }
 0x37e   : > { %2984 = vmatprep.mubr.msk.bf16.mxu1 %vm3235_vm1, %v3234_v3  ;;  %2983 = vmatpush3.bf16.msra.mxu1 %v1820_v47 }
 0x442   : > { %v1568_v2 = vpop.f32.mrb[12].mxu0 }
 0x443   : > { %v2956_v4 = vpop.f32.mrb[13].mxu0 }
 0x444   : > { %v1571_v7 = vpop.f32.mrb[14].mxu0 }
 0x445   : > { %v2957_v8 = vpop.f32.mrb[15].mxu0 }
 0x448   : > { %v1613_v14 = vpop.f32.mrb[20].mxu1 }
 0x449   : > { %v1620_v15 = vrot.slane %v1613_v14, 5  ;;  %v2962_v16 = vpop.f32.mrb[21].mxu1 }
 0x44a   : > { %v1616_v17 = vpop.f32.mrb[22].mxu1  ;;  %v1697_v20 = vpop.f32.mrb[16].mxu0 }
 0x44b   : > { %v1623_v22 = vsel %vm1622_vm6, %v1568_v2, %v1620_v15  ;;  %v1698_v24 = vadd.f32 %v1697_v20, %v1653_v12  ;;  %v2963_v25 = vpop.f32.mrb[23].mxu1  ;;  %v2968_v27 = vpop.f32.mrb[17].mxu0  ;;  %v2799_v15 = vld [vmem:[%s3841_s24] ss:$0 sm:$0xff] (!%p2760_p3) }
 0x44c   : > { %v1700_v28 = vpop.f32.mrb[18].mxu0  ;;  %v1866_v58 = vpack.c.bf16 %v1623_v22, %v1623_v22 }
 0x44d   : > { %v2969_v29 = vpop.f32.mrb[19].mxu0  ;;  %v1747_v30 = vsel %vm1746_vm7, %v1698_v24, -inf }
 0x44e   : > { %1748 = vmax.xlane.f32.xlu0 %v1747_v30 }
 0x450   : > { %v1740_v32 = vpop.f32.mrb[24].mxu1 }
 0x451   : > { %v1741_v33 = vadd.f32 %v1740_v32, %v1657_v31  ;;  %v2974_v34 = vpop.f32.mrb[25].mxu1 }
 0x452   : > { %v1743_v35 = vpop.f32.mrb[26].mxu1 }
 0x453   : > { %v2975_v23 = vpop.f32.mrb[27].mxu1  ;;  %v1750_v36 = vsel %vm1746_vm7, %v1741_v33, -inf }
 0x454   : > { %1751 = vmax.xlane.f32.xlu1 %v1750_v36 }
 0x4db   : > { %v1749_v37 = vpop.xlane.xlu0 %1748 }
 0x4dc   : > { %v1753_v38 = vsub.f32 %v1698_v24, %v1749_v37 }
 0x4de   : > { %v1755_v39 = vmul.f32 1.442695, %v1753_v38 }
 0x4e0   : > { %3143 = vpow2.f32 %v1755_v39 }
 0x4e1   : > { %v1752_v40 = vpop.xlane.xlu1 %1751 }
 0x4e2   : > { %v1754_v41 = vsub.f32 %v1741_v33, %v1752_v40 }
 0x4e4   : > { %v1757_v42 = vmul.f32 1.442695, %v1754_v41 }
 0x4e6   : > { %3145 = vpow2.f32 %v1757_v42 }
 0x4ea   : > { %v3144_v43 = vpop.eup %3143 }
 0x4eb   : > { %v1759_v26 = vsel %vm1746_vm7, %v3144_v43, 0.0 }
 0x4ec   : > { %1760 = vadd.xlane.f32.xlu0 %v1759_v26 }
 0x4f0   : > { %v3146_v44 = vpop.eup %3145 }
 0x4f1   : > { %v1762_v45 = vsel %vm1746_vm7, %v3146_v44, 0.0 }
 0x4f2   : > { %1763 = vadd.xlane.f32.xlu1 %v1762_v45 }
 0x502   : > { %1936 = vrot.lane.b32.xlu0 (!%p2760_p3), %v2799_v15, %s3237_s5 }
 0x579   : > { %v1761_v48 = vpop.xlane.xlu0 %1760 }
 0x57a   : > { %3147 = vrcp.f32 %v1761_v48 }
 0x57d   : > { %v1937_v16 = vpop.permute.xlu0 (!%p2760_p3), %1936 }
 0x57f   : > { %v1764_v49 = vpop.xlane.xlu1 %1763 }
 0x580   : > { %3149 = vrcp.f32 %v1764_v49 }
 0x584   : > { %v3148_v50 = vpop.eup %3147 }
 0x585   : > { %v1767_v51 = vmul.f32 %v3148_v50, %v3144_v43 }
 0x587   : > { %v3651_v53 = vpack.c.bf16 %v1767_v51, %v1767_v51 }
 0x589   : > { %2979 = vmatmul.mubr.msk.bf16.vlgmr.msra.gmra.mrb[20].mxu0 %vm1771_vm8, %v3651_v53 }
 0x58a   : > { %v3150_v54 = vpop.eup %3149  ;;  %2989 = vmatpush3.bf16.msra.mxu0 %v3123_v52  ;;  %2992 = vmatprep.mubr.msk.bf16.mxu0 %vm3235_vm1, %v3234_v3 }
 0x58b   : > { %v1768_v56 = vmul.f32 %v3150_v54, %v3146_v44  ;;  %2990 = vmatprep.subr.bf16.mxu0 %v3234_v3 }
 0x58d   : > { %v3661_v57 = vpack.c.bf16 %v1768_v56, %v1768_v56 }
 0x58e   : > { %2991 = vmatpush3.bf16.msra.mxu0 %v3124_v55 }
 0x58f   : > { %2985 = vmatmul.mubr.msk.bf16.vlgmr.msra.gmra.mrb[28].mxu1 %vm1771_vm8, %v3661_v57 }
 0x591   : > { %2993 = vmatmul.mubr.msk.bf16.vlgmr.msra.gmra.mrb[24].mxu0 %vm994_vm2, %v1866_v58 }
 0x65c   : > { %v1811_v19 = vpop.f32.mrb[20].mxu0 }
 0x65d   : > { %v2980_v21 = vpop.f32.mrb[21].mxu0 }
 0x65e   : > { %v1814_v60 = vpop.f32.mrb[22].mxu0 }
 0x65f   : > { %v2981_v61 = vpop.f32.mrb[23].mxu0 }
 0x661   : > { %1929 = sbr.rel (%p2760_p3) target bundleno = 1755 (0x6db), region = 132 }
 0x662   : > { %v1856_v62 = vpop.f32.mrb[28].mxu1 }
 0x663   : > { %v1863_v0 = vrot.slane %v1856_v62, 5  ;;  %v2986_v1 = vpop.f32.mrb[29].mxu1 }
 0x664   : > { %v1859_v2 = vpop.f32.mrb[30].mxu1  ;;  %v3666_v4 = vpop.f32.mrb[24].mxu0 }
 0x665   : > { %v1865_v6 = vsel %vm1622_vm6, %v1811_v19, %v1863_v0  ;;  %v2987_v7 = vpop.f32.mrb[31].mxu1  ;;  %v2994_v8 = vpop.f32.mrb[25].mxu0  ;;  %v1939_v5 = vadd.f32 (!%p2760_p3), %v1937_v16, %v3666_v4 }
 0x666   : > { %v1867_v11 = vpack.c.bf16 %v1865_v6, %v1865_v6  ;;  %v1924_v12 = vpop.f32.mrb[26].mxu0 }
 0x667   : > { %v2995_v14 = vpop.f32.mrb[27].mxu0  ;;  %1941 = vrot.lane.b32.xlu0 (!%p2760_p3), %v1939_v5, %s3238_s3 }
 0x6d9   : > { %v1942_v17 = vpop.permute.xlu0 %1941 }
 0x6da   : > { %1945 = vst.msk [vmem:[%s3843_s26] sm:$0x3f] %vm1944_vm9, %v1942_v17 }
 0x6db PF: > { %2996 = vmatprep.subr.bf16.mxu1 %v3234_v3  ;;  %3004 = vmatprep.subr.bf16.mxu0 %v3234_v3  ;;  %v3155_v20 = vld [vmem:[%s3836_s19] sm:$0xff]   ;;  %v3157_v24 = vld [vmem:[%s3836_s19 + $0x8] sm:$0xff]   ;;  %s3882_s5 = sld [smem:[#allocation17_spill]]  ;;  %vm2127_vm10 = vcmask 21504   ;;  %vm2219_vm11 = vcmask 521216   ;;  %s3883_s28 = sld [smem:[#allocation16_spill]] }
 0x6dc   : > { %v3156_v22 = vld [vmem:[%s3838_s21] sm:$0xff]   ;;  %3000 = vmatprep.mubr.msk.bf16.mxu1 %vm3235_vm1, %v3234_v3  ;;  %3008 = vmatprep.mubr.msk.bf16.mxu0 %vm3235_vm1, %v3234_v3  ;;  %v3158_v25 = vld [vmem:[%s3838_s21 + $0x8] sm:$0xff]   ;;  %s3884_s27 = sld [smem:[#allocation15_spill]]  ;;  %v3240_v12 = vmov 0   ;;  %vm2492_vm15 = vcmask 523264   ;;  %vm2536_vm0 = vcmask 259072  }
 0x6dd   : > { %2997 = vmatpush3.bf16.msra.mxu1 %v3155_v20  ;;  %3005 = vmatpush3.bf16.msra.mxu0 %v3156_v22  ;;  %v3159_v27 = vld [vmem:[%s3839_s22] sm:$0xff]   ;;  %v3160_v29 = vld [vmem:[%s3839_s22 + $0x8] sm:$0xff]   ;;  %2538 = vst.msk [vmem:[#allocation2] sm:$0x3f] %vm2536_vm0, %v3562_v9 }
 0x6de   : > { %2998 = vmatprep.subr.bf16.mxu1 %v3234_v3  ;;  %3006 = vmatprep.subr.bf16.mxu0 %v3234_v3  ;;  %v2809_v45 = vld [vmem:[%s3840_s23] ss:$0 sm:$0xff] }
 0x6df   : > { %3151 = vset.pattern.permute.xlu0 %v3240_v12 }
 0x6e1   : > { %2999 = vmatpush3.bf16.msra.mxu1 %v3157_v24  ;;  %3007 = vmatpush3.bf16.msra.mxu0 %v3158_v25  ;;  %v3161_v28 = vld [vmem:[%s3882_s5] sm:$0xff]   ;;  %v3162_v31 = vld [vmem:[%s3882_s5 + $0x8] sm:$0xff]   ;;  %v3163_v33 = vld [vmem:[%s3882_s5 + $0x10] sm:$0xff]  }
 0x6e2   : > { %3012 = vmatprep.subr.bf16.mxu1 %v3234_v3  ;;  %3020 = vmatprep.subr.bf16.mxu0 %v3234_v3  ;;  %v2168_v30 = vsel %vm994_vm2, %v3161_v28, 0  ;;  %v2171_v32 = vsel %vm994_vm2, %v3162_v31, 0  ;;  %v3164_v34 = vld [vmem:[%s3882_s5 + $0x18] sm:$0xff]   ;;  %v2237_v58 = vld [vmem:[%s3883_s28] sm:$0x7]  ;;  %s3885_s4 = smov %s3884_s27 }
 0x6e3   : > { %v2177_v35 = vsel %vm994_vm2, %v3164_v34, 0  ;;  %v2238_v19 = vld [vmem:[%s3883_s28 + $0x4] sm:$0x7]  ;;  %v2240_v21 = vsel %vm1622_vm6, %v2237_v58, 0  ;;  %v2335_v61 = vld [vmem:[%s3884_s27] sm:$0xf] }
 0x6e4   : > { %3001 = vmatmul.mubr.msk.bf16.vlgmr.msra.gmra.mrb[32].mxu1 %vm994_vm2, %v3566_v10  ;;  %3009 = vmatmul.mubr.msk.bf16.vlgmr.msra.gmra.mrb[28].mxu0 %vm994_vm2, %v1867_v11  ;;  %v2283_v60 = vsel %vm1622_vm6, %v2238_v19, 0  ;;  %v2338_v62 = vsel %vm1531_vm4, %v2335_v61, 0  ;;  %v3165_v19 = vld [vmem:[%s3882_s5] sm:$0xff]  }
 0x6e5   : > { %3013 = vmatpush3.bf16.msra.mxu1 %v3159_v27  ;;  %3016 = vmatprep.mubr.msk.bf16.mxu1 %vm3235_vm1, %v3234_v3 }
 0x6e6   : > { %3014 = vmatprep.subr.bf16.mxu1 %v3234_v3  ;;  %3028 = vmatprep.mubr.msk.bf16.mxu0 %vm3235_vm1, %v3234_v3 }
 0x6e9   : > { %3015 = vmatpush3.bf16.msra.mxu1 %v3160_v29 }
 0x6ea   : > { %3032 = vmatprep.subr.bf16.mxu1 %v3234_v3  ;;  %3021 = vmatpush3.bf16.xpose.msra.mxu0 %v2168_v30 }
 0x6eb   : > { %3022 = vmatprep.subr.bf16.mxu0 %v3234_v3 }
 0x6ec   : > { %3017 = vmatmul.mubr.msk.bf16.vlgmr.msra.gmra.mrb[36].mxu1 %vm994_vm2, %v3491_v13  ;;  %v2174_v13 = vsel %vm994_vm2, %v3163_v33, 0 }
 0x6ed   : > { %3034 = vmatprep.mubr.msk.bf16.mxu1 %vm3235_vm1, %v3234_v3  ;;  %3033 = vmatpush3.bf16.msra.mxu1 %v2240_v21  ;;  %v3166_v21 = vld [vmem:[%s3882_s5 + $0x8] sm:$0xff]  }
 0x6ee   : > { %3038 = vmatprep.subr.bf16.mxu1 %v3234_v3 }
 0x6f2   : > { %3023 = vmatpush3.bf16.xpose.msra.mxu0 %v2171_v32 }
 0x6f3   : > { %3024 = vmatprep.subr.bf16.mxu0 %v3234_v3 }
 0x6f4   : > { %3035 = vmatmul.mubr.msk.bf16.vlgmr.msra.gmra.mrb[40].mxu1 %vm1771_vm8, %v3651_v53  ;;  %v2336_v53 = vld [vmem:[%s3885_s4 + $0x4] sm:$0xf] }
 0x6f5   : > { %3039 = vmatpush3.bf16.msra.mxu1 %v2283_v60  ;;  %3040 = vmatprep.mubr.msk.bf16.mxu1 %vm3235_vm1, %v3234_v3  ;;  %v2381_v0 = vsel %vm1531_vm4, %v2336_v53, 0  ;;  %v3167_v53 = vld [vmem:[%s3882_s5 + $0x10] sm:$0xff]  }
 0x6f6   : > { %3044 = vmatprep.subr.bf16.mxu1 %v3234_v3 }
 0x6fa   : > { %3025 = vmatpush3.bf16.xpose.msra.mxu0 %v2174_v13 }
 0x6fb   : > { %3026 = vmatprep.subr.bf16.mxu0 %v3234_v3 }
 0x6fc   : > { %3041 = vmatmul.mubr.msk.bf16.vlgmr.msra.gmra.mrb[44].mxu1 %vm1771_vm8, %v3661_v57 }
 0x6fd   : > { %3045 = vmatpush3.bf16.msra.mxu1 %v2338_v62  ;;  %3046 = vmatprep.mubr.msk.bf16.mxu1 %vm3235_vm1, %v3234_v3 }
 0x6fe   : > { %3050 = vmatprep.subr.bf16.mxu1 %v3234_v3 }
 0x702   : > { %3027 = vmatpush3.bf16.xpose.msra.mxu0 %v2177_v35 }
 0x703   : > { %3056 = vmatprep.subr.bf16.mxu0 %v3234_v3 }
 0x704   : > { %3047 = vmatmul.mubr.msk.bf16.vlgmr.msra.gmra.mrb[48].mxu1 %vm1527_vm5, %v3604_v59  ;;  %v3239_v59 = vmov 1  }
 0x705   : > { %3051 = vmatpush3.bf16.msra.mxu1 %v2381_v0  ;;  %3052 = vmatprep.mubr.msk.bf16.mxu1 %vm3235_vm1, %v3234_v3  ;;  %v3168_v0 = vld [vmem:[%s3882_s5 + $0x18] sm:$0xff]  }
 0x706   : > { %3152 = vset.pattern.permute.xlu1 %v3239_v59 }
 0x709   : > { %3029 = vmatmul.mubr.msk.bf16.vlgmr.msra.gmra.mrb[32].mxu0 %vm994_vm2, %v3566_v10 }
 0x70a   : > { %3064 = vmatprep.mubr.msk.bf16.mxu0 %vm3235_vm1, %v3234_v3  ;;  %3057 = vmatpush3.bf16.msra.mxu0 %v3165_v19 }
 0x70b   : > { %3058 = vmatprep.subr.bf16.mxu0 %v3234_v3 }
 0x70c   : > { %3053 = vmatmul.mubr.msk.bf16.vlgmr.msra.gmra.mrb[52].mxu1 %vm1527_vm5, %v3616_v63 }
 0x70e   : > { %3059 = vmatpush3.bf16.msra.mxu0 %v3166_v21 }
 0x70f   : > { %3060 = vmatprep.subr.bf16.mxu0 %v3234_v3 }
 0x712   : > { %3061 = vmatpush3.bf16.msra.mxu0 %v3167_v53 }
 0x713   : > { %3062 = vmatprep.subr.bf16.mxu0 %v3234_v3 }
 0x716   : > { %3063 = vmatpush3.bf16.msra.mxu0 %v3168_v0 }
 0x7b7   : > { %v1996_v23 = vpop.f32.mrb[32].mxu1  ;;  %v2055_v38 = vpop.f32.mrb[28].mxu0 }
 0x7b8   : > { %v1997_v36 = vadd.f32 %v1996_v23, %v3666_v4  ;;  %v3002_v37 = vpop.f32.mrb[33].mxu1  ;;  %v3010_v40 = vpop.f32.mrb[29].mxu0 }
 0x7b9   : > { %v1999_v39 = vpop.f32.mrb[34].mxu1  ;;  %v2058_v43 = vpop.f32.mrb[30].mxu0  ;;  %v3241_v40 = vmov 2  }
 0x7ba   : > { %v3003_v41 = vpop.f32.mrb[35].mxu1  ;;  %v2061_v42 = vadd.f32 %v2055_v38, %v1997_v36  ;;  %v3011_v26 = vpop.f32.mrb[31].mxu0 }
 0x7bf   : > { %v2112_v44 = vpop.f32.mrb[36].mxu1 }
 0x7c0   : > { %v2118_v10 = vadd.f32 %v2112_v44, %v2061_v42  ;;  %v3018_v46 = vpop.f32.mrb[37].mxu1 }
 0x7c1   : > { %v2115_v47 = vpop.f32.mrb[38].mxu1 }
 0x7c2   : > { %v3019_v48 = vpop.f32.mrb[39].mxu1  ;;  %v2126_v49 = vadd.f32 %v2809_v45, %v2118_v10 }
 0x7c4   : > { %v2128_v50 = vsel %vm2127_vm10, %v2126_v49, -inf }
 0x7c5   : > { %2129 = vmax.xlane.f32.xlu0 %v2128_v50 }
 0x7c7   : > { %v2276_v63 = vpop.f32.mrb[40].mxu1 }
 0x7c8   : > { %v3036_v16 = vpop.f32.mrb[41].mxu1 }
 0x7c9   : > { %v2279_v5 = vpop.f32.mrb[42].mxu1 }
 0x7ca   : > { %v3037_v17 = vpop.f32.mrb[43].mxu1 }
 0x7cf   : > { %v2319_v20 = vpop.f32.mrb[44].mxu1 }
 0x7d0   : > { %v3042_v22 = vpop.f32.mrb[45].mxu1  ;;  %v2326_v27 = vrot.slane %v2319_v20, 5 }
 0x7d1   : > { %v2322_v24 = vpop.f32.mrb[46].mxu1 }
 0x7d2   : > { %v3043_v25 = vpop.f32.mrb[47].mxu1  ;;  %v2328_v32 = vsel %vm1622_vm6, %v2276_v63, %v2326_v27 }
 0x7d7   : > { %v2374_v28 = vpop.f32.mrb[48].mxu1 }
 0x7d8   : > { %v3048_v29 = vpop.f32.mrb[49].mxu1 }
 0x7d9   : > { %v2377_v30 = vpop.f32.mrb[50].mxu1 }
 0x7da   : > { %v3049_v31 = vpop.f32.mrb[51].mxu1 }
 0x7dc   : > { %v2213_v51 = vpop.f32.mrb[32].mxu0 }
 0x7dd   : > { %v2220_v52 = vsel %vm2219_vm11, %v2213_v51, -inf  ;;  %v3030_v54 = vpop.f32.mrb[33].mxu0 }
 0x7de   : > { %2221 = vmax.xlane.f32.xlu0 %v2220_v52  ;;  %v2216_v55 = vpop.f32.mrb[34].mxu0 }
 0x7df   : > { %v3031_v56 = vpop.f32.mrb[35].mxu0  ;;  %v2417_v33 = vpop.f32.mrb[52].mxu1 }
 0x7e0   : > { %v3054_v13 = vpop.f32.mrb[53].mxu1  ;;  %v2424_v36 = vrot.slane %v2417_v33, 5 }
 0x7e1   : > { %v2420_v34 = vpop.f32.mrb[54].mxu1 }
 0x7e2   : > { %v3055_v23 = vpop.f32.mrb[55].mxu1  ;;  %v2426_v37 = vsel %vm1622_vm6, %v2374_v28, %v2424_v36 }
 0x852   : > { %v2130_v57 = vpop.xlane.xlu0 %2129 }
 0x853   : > { %v2131_v1 = vsub.f32 %v2126_v49, %v2130_v57 }
 0x855   : > { %v2132_v2 = vmul.f32 1.442695, %v2131_v1 }
 0x857   : > { %3169 = vpow2.f32 %v2132_v2 }
 0x861   : > { %v3170_v4 = vpop.eup %3169 }
 0x862   : > { %v2134_v6 = vsel %vm2127_vm10, %v3170_v4, 0.0 }
 0x863   : > { %2135 = vadd.xlane.f32.xlu1 %v2134_v6 }
 0x86b   : > { %v2222_v7 = vpop.xlane.xlu0 %2221 }
 0x86c   : > { %v2223_v8 = vsub.f32 %v2213_v51, %v2222_v7  ;;  %v2435_v51 = vand.u32 127, %v1390_v18 }
 0x86e   : > { %v2224_v11 = vmul.f32 1.442695, %v2223_v8 }
 0x870   : > { %3171 = vpow2.f32 %v2224_v11 }
 0x87a   : > { %v3172_v14 = vpop.eup %3171 }
 0x87b   : > { %v2226_v15 = vsel %vm2219_vm11, %v3172_v14, 0.0 }
 0x87c   : > { %2227 = vadd.xlane.f32.xlu1 %v2226_v15 }
 0x8f0   : > { %v2136_v35 = vpop.xlane.xlu1 %2135 }
 0x8f1   : > { %3173 = vrcp.f32 %v2136_v35 }
 0x8fb   : > { %v3174_v38 = vpop.eup %3173 }
 0x8fc   : > { %v2138_v39 = vmul.f32 %v3174_v38, %v3170_v4 }
 0x8fe   : > { %2233 = vperm.xlu0 %3151, %v2138_v39   ;;  %2330 = vperm.xlu1 %3152, %v2138_v39  }
 0x902   : > { %3153 = vset.pattern.permute.xlu1 %v3241_v40  ;;  %3154 = vset.pattern.permute.xlu0 %v3241_v40 }
 0x903   : > { %2428 = vperm.xlu1 %3153, %v2138_v39  }
 0x909   : > { %v2228_v41 = vpop.xlane.xlu1 %2227 }
 0x90a   : > { %3175 = vrcp.f32 %v2228_v41 }
 0x914   : > { %v3176_v42 = vpop.eup %3175 }
 0x915   : > { %v2230_v26 = vmul.f32 %v3176_v42, %v3172_v14 }
 0x97d   : > { %v2331_v43 = vpop.permute.xlu1 %2330  ;;  %v2234_v44 = vpop.permute.xlu0 %2233 }
 0x97e   : > { %v2333_v45 = vmul.f32 %v2331_v43, %v2328_v32  ;;  %v2236_v10 = vmul.f32 %v2234_v44, %v2230_v26 }
 0x980   : > { %v2334_v47 = vadd.f32 %v2333_v45, %v2236_v10 }
 0x982   : > { %v2429_v46 = vpop.permute.xlu1 %2428 }
 0x983   : > { %v2431_v48 = vmul.f32 %v2429_v46, %v2426_v37 }
 0x985   : > { %v2432_v49 = vadd.f32 %v2431_v48, %v2334_v47 }
 0x987   : > { %2433 = vst.msk [vmem:[%s3441_s1] sm:$0x3f] %vm2219_vm11, %v2432_v49  ;;  %v2436_v50 = vsel %vm2219_vm11, %v2432_v49, -inf }
 0x988   : > { %2437 = vmax.xlane.f32.xlu1 %v2436_v50 }
 0xa15   : > { %v2438_v52 = vpop.xlane.xlu1 %2437 }
 0xa16   : > { %vm2439_vm12 = vcmp.eq.f32.partialorder %v2432_v49, %v2438_v52 }
 0xa17   : > { %v2440_v54 = vsel %vm2439_vm12, %v2435_v51, 64 }
 0xa18   : > { %v2441_v55 = vsel %vm2219_vm11, %v2440_v54, 2147483647 }
 0xa19   : > { %v2443_v56 = vshra.s32 %v2441_v55, 16  ;;  %v2442_v18 = vand.u32 65535, %v2441_v55 }
 0xa1b   : > { %v2445_v58 = vcvt.s32.f32 %v2443_v56  ;;  %v2444_v61 = vcvt.s32.f32 %v2442_v18 }
 0xa1d   : > { %2446 = vmin.xlane.f32.xlu0 %v2445_v58 }
 0xaaa   : > { %v2447_v60 = vpop.xlane.xlu0 %2446 }
 0xaab   : > { %vm2448_vm13 = vcmp.eq.f32.partialorder %v2445_v58, %v2447_v60  ;;  %v2453_v57 = vcvt.f32.s32 %v2447_v60 }
 0xaac   : > { %v2449_v62 = vsel %vm2448_vm13, %v2444_v61, inf }
 0xaad   : > { %2450 = vmin.xlane.f32.xlu1 %v2449_v62  ;;  %v2454_v2 = vshll.u32 %v2453_v57, 16 }
 0xb3a   : > { %v2451_v1 = vpop.xlane.xlu1 %2450 }
 0xb3b   : > { %v2452_v4 = vcvt.f32.s32 %v2451_v1 }
 0xb3d   : > { %v2455_v6 = vadd.s32 %v2454_v2, %v2452_v4 }
 0xb3f   : > { %vm2456_vm14 = vcmp.eq.s32.totalorder %v2435_v51, %v2455_v6 }
 0xb40   : > { %v2819_v7 = vsel %vm2456_vm14, 1.0, %v3234_v3 }
 0xb41   : > { %v2459_v8 = vpack.c.bf16 %v2819_v7, %v2819_v7 }
 0xb43   : > { %3065 = vmatmul.mubr.msk.bf16.vlgmr.msra.gmra.mrb[36].mxu0 %vm2492_vm15, %v2459_v8 }
 0xc16   : > { %v2530_v11 = vpop.f32.mrb[36].mxu0 }
 0xc17   : > { %2537 = vst.msk [vmem:[#allocation3] sm:$0x3f] %vm2536_vm0, %v2530_v11  ;;  %v3066_v59 = vpop.f32.mrb[37].mxu0 }
 0xc18   : > { %v2533_v12 = vpop.f32.mrb[38].mxu0 }
 0xc19   : > { %v3067_v14 = vpop.f32.mrb[39].mxu0 }
 0xc1a PF: > { %s38_s7 = sadd.s32 1, %s3231_s7   ;;  %s3886_s27 = sld [smem:[#allocation7_spill]] }
 0xc1b   : > { %p35_p4 = scmp.ge.s32.totalorder %s38_s7, 6   ;;  %s3887_s3 = sld [smem:[#allocation8_spill]] }
 0xc1d   :  { %37 = sbr.rel (!%p35_p4) target bundleno = 14 (0xe), region = 194 }
 0xc24   :  { %2578 = vsyncpa [#allocation5], 1 }
 0xc25   :  { %2580 = vsyncpa [#allocation5 + $0x1], 1 }

</bundles_post_ra>
